<compile_context>
chip_gen: v6e
topology: v6e:2x2x1
jax: 0.10.0
libtpu: 0.0.40
codegen_flags: <defaults>
</compile_context>

<pallas_src>
import functools

import jax
import jax.numpy as jnp
from jax.experimental import pallas as pl
from jax.experimental.pallas import tpu as pltpu

EPS = 1e-5                      # nn.BatchNorm2d default eps
VMEM_LIMIT = 64 * 1024 * 1024   # 128 MiB physical on v5e/v6e; bf16 tiles keep v7x happy
TILE_M = 1024                   # M-tile target; keep <= 1024 on v7x (64 MiB VMEM)


def _pick_tile(m, target=TILE_M):
    """Largest divisor of m that is a multiple of 8 (or m itself), <= target."""
    t = min(m, target)
    while t >= 8:
        if m % t == 0 and (t % 8 == 0 or t == m):
            return t
        t -= 1
    return m


# ----------------------------- Pallas kernels ------------------------------ #

def _pw_conv_stats_kernel(x_ref, w_ref, sc_ref, sh_ref,
                          y_ref, sum_ref, sumsq_ref, *, pre_act):
    """[optional fused BN-apply+ReLU of previous stage] + 1x1 conv (bf16 MXU
    matmul, f32 accum) + per-TILE partial sum/sumsq for this stage's BN.
    No cross-step accumulation -> grid axis is megacore-parallel safe."""
    x = x_ref[...]
    if pre_act:
        x = jnp.maximum(x.astype(jnp.float32) * sc_ref[...] + sh_ref[...], 0.0)
    y = jnp.dot(x.astype(jnp.bfloat16), w_ref[...],
                preferred_element_type=jnp.float32)
    y_ref[...] = y.astype(y_ref.dtype)                      # bf16 to HBM
    sum_ref[...] = jnp.sum(y, axis=0, keepdims=True)        # partial stats (f32)
    sumsq_ref[...] = jnp.sum(y * y, axis=0, keepdims=True)


def _pw_conv_dual_stats_kernel(x_ref, wa_ref, wb_ref,
                               ya_ref, yb_ref,
                               sa_ref, ssa_ref, sb_ref, ssb_ref):
    """Fused conv1 + projection-shortcut conv: x is read from HBM once, two
    MXU matmuls, two bf16 outputs, two pairs of per-tile partial BN stats."""
    xb = x_ref[...].astype(jnp.bfloat16)
    ya = jnp.dot(xb, wa_ref[...], preferred_element_type=jnp.float32)
    yb = jnp.dot(xb, wb_ref[...], preferred_element_type=jnp.float32)
    ya_ref[...] = ya.astype(ya_ref.dtype)
    yb_ref[...] = yb.astype(yb_ref.dtype)
    sa_ref[...] = jnp.sum(ya, axis=0, keepdims=True)
    ssa_ref[...] = jnp.sum(ya * ya, axis=0, keepdims=True)
    sb_ref[...] = jnp.sum(yb, axis=0, keepdims=True)
    ssb_ref[...] = jnp.sum(yb * yb, axis=0, keepdims=True)


def _conv3x3_stats_kernel(y1_ref, w_ref, sc_ref, sh_ref,
                          y2_ref, sum_ref, sumsq_ref, patch_ref):
    """Fused BN1-apply + ReLU + 3-tap horizontal im2col into a (H+2, W, 3C)
    VMEM scratch (zero row-halo top/bottom, re-zeroed every step so the grid
    can be megacore-parallel) + three row-offset K=3C MXU matmuls + per-image
    partial sum/sumsq for BN2.  No (9, M, C) taps tensor ever hits HBM and the
    im2col store traffic is 3x smaller than a 9-tap scatter."""
    _, h, w, c = y1_ref.shape

    # BN1-apply + ReLU (f32 math), cast to bf16 for the MXU.
    h1 = jnp.maximum(y1_ref[0].astype(jnp.float32) * sc_ref[...] + sh_ref[...], 0.0)
    h1 = h1.astype(jnp.bfloat16)

    # Zero halo rows + x-edge slivers every step (cheap; parallel-grid safe).
    patch_ref[0:1, :, :] = jnp.zeros((1, w, 3 * c), jnp.bfloat16)
    patch_ref[h + 1:h + 2, :, :] = jnp.zeros((1, w, 3 * c), jnp.bfloat16)
    patch_ref[1:h + 1, 0:1, 0:c] = jnp.zeros((h, 1, c), jnp.bfloat16)
    patch_ref[1:h + 1, w - 1:w, 2 * c:3 * c] = jnp.zeros((h, 1, c), jnp.bfloat16)

    # Three horizontal taps (dx = -1, 0, +1) of the pad=1 conv.
    patch_ref[1:h + 1, 1:w, 0:c] = h1[:, 0:w - 1, :]
    patch_ref[1:h + 1, :, c:2 * c] = h1
    patch_ref[1:h + 1, 0:w - 1, 2 * c:3 * c] = h1[:, 1:w, :]

    # Row-offset matmuls: out[y, x] = sum_dy patch[y + dy, x] @ W_row[dy].
    # (W % 8 == 0 keeps the (H+2, W, 3C) -> ((H+2)*W, 3C) reshape layout-clean.)
    p = patch_ref[...].reshape((h + 2) * w, 3 * c)
    hw = h * w
    y2 = jnp.dot(p[0:hw], w_ref[0], preferred_element_type=jnp.float32)
    y2 = y2 + jnp.dot(p[w:w + hw], w_ref[1], preferred_element_type=jnp.float32)
    y2 = y2 + jnp.dot(p[2 * w:2 * w + hw], w_ref[2], preferred_element_type=jnp.float32)

    y2_ref[0] = y2.reshape(h, w, c).astype(y2_ref.dtype)     # bf16 to HBM
    sum_ref[...] = jnp.sum(y2, axis=0, keepdims=True)         # per-image partials
    sumsq_ref[...] = jnp.sum(y2 * y2, axis=0, keepdims=True)


def _bn_add_relu_kernel(res_ref, sc_ref, rs_ref, rb_ref, ss_ref, sb_ref, o_ref):
    """Fused BN-apply of residual + BN-apply (or identity) of shortcut + add + ReLU."""
    res = res_ref[...].astype(jnp.float32) * rs_ref[...] + rb_ref[...]
    sc = sc_ref[...].astype(jnp.float32) * ss_ref[...] + sb_ref[...]
    o_ref[...] = jnp.maximum(res + sc, 0.0)


# --------------------------- pallas_call wrappers --------------------------- #

def pw_conv_stats(x2d, w, in_scale, in_shift, *, pre_act, tile_target=TILE_M):
    m, cin = x2d.shape
    cout = w.shape[1]
    tm = _pick_tile(m, tile_target)
    nt = m // tm
    return pl.pallas_call(
        functools.partial(_pw_conv_stats_kernel, pre_act=pre_act),
        grid=(nt,),
        in_specs=[
            pl.BlockSpec((tm, cin), lambda i: (i, 0)),
            pl.BlockSpec((cin, cout), lambda i: (0, 0)),
            pl.BlockSpec((1, cin), lambda i: (0, 0)),
            pl.BlockSpec((1, cin), lambda i: (0, 0)),
        ],
        out_specs=(
            pl.BlockSpec((tm, cout), lambda i: (i, 0)),
            pl.BlockSpec((1, cout), lambda i: (i, 0)),
            pl.BlockSpec((1, cout), lambda i: (i, 0)),
        ),
        out_shape=(
            jax.ShapeDtypeStruct((m, cout), jnp.bfloat16),
            jax.ShapeDtypeStruct((nt, cout), jnp.float32),
            jax.ShapeDtypeStruct((nt, cout), jnp.float32),
        ),
        compiler_params=pltpu.CompilerParams(
            dimension_semantics=("parallel",),
            vmem_limit_bytes=VMEM_LIMIT),
    )(x2d, w.astype(jnp.bfloat16), in_scale, in_shift)


def pw_conv_dual_stats(x2d, w_a, w_b, *, tile_target=TILE_M):
    m, cin = x2d.shape
    ca, cb = w_a.shape[1], w_b.shape[1]
    tm = _pick_tile(m, tile_target)
    nt = m // tm
    return pl.pallas_call(
        _pw_conv_dual_stats_kernel,
        grid=(nt,),
        in_specs=[
            pl.BlockSpec((tm, cin), lambda i: (i, 0)),
            pl.BlockSpec((cin, ca), lambda i: (0, 0)),
            pl.BlockSpec((cin, cb), lambda i: (0, 0)),
        ],
        out_specs=(
            pl.BlockSpec((tm, ca), lambda i: (i, 0)),
            pl.BlockSpec((tm, cb), lambda i: (i, 0)),
            pl.BlockSpec((1, ca), lambda i: (i, 0)),
            pl.BlockSpec((1, ca), lambda i: (i, 0)),
            pl.BlockSpec((1, cb), lambda i: (i, 0)),
            pl.BlockSpec((1, cb), lambda i: (i, 0)),
        ),
        out_shape=(
            jax.ShapeDtypeStruct((m, ca), jnp.bfloat16),
            jax.ShapeDtypeStruct((m, cb), jnp.bfloat16),
            jax.ShapeDtypeStruct((nt, ca), jnp.float32),
            jax.ShapeDtypeStruct((nt, ca), jnp.float32),
            jax.ShapeDtypeStruct((nt, cb), jnp.float32),
            jax.ShapeDtypeStruct((nt, cb), jnp.float32),
        ),
        compiler_params=pltpu.CompilerParams(
            dimension_semantics=("parallel",),
            vmem_limit_bytes=VMEM_LIMIT),
    )(x2d, w_a.astype(jnp.bfloat16), w_b.astype(jnp.bfloat16))


def conv3x3_stats(y1_nhwc, w_rows, in_scale, in_shift):
    n, h, w, c = y1_nhwc.shape
    return pl.pallas_call(
        _conv3x3_stats_kernel,
        grid=(n,),
        in_specs=[
            pl.BlockSpec((1, h, w, c), lambda i: (i, 0, 0, 0)),
            pl.BlockSpec((3, 3 * c, c), lambda i: (0, 0, 0)),
            pl.BlockSpec((1, c), lambda i: (0, 0)),
            pl.BlockSpec((1, c), lambda i: (0, 0)),
        ],
        out_specs=(
            pl.BlockSpec((1, h, w, c), lambda i: (i, 0, 0, 0)),
            pl.BlockSpec((1, c), lambda i: (i, 0)),
            pl.BlockSpec((1, c), lambda i: (i, 0)),
        ),
        out_shape=(
            jax.ShapeDtypeStruct((n, h, w, c), jnp.bfloat16),
            jax.ShapeDtypeStruct((n, c), jnp.float32),
            jax.ShapeDtypeStruct((n, c), jnp.float32),
        ),
        scratch_shapes=[pltpu.VMEM((h + 2, w, 3 * c), jnp.bfloat16)],  # 3-tap im2col
        compiler_params=pltpu.CompilerParams(
            dimension_semantics=("parallel",),
            vmem_limit_bytes=VMEM_LIMIT),
    )(y1_nhwc, w_rows.astype(jnp.bfloat16), in_scale, in_shift)


def bn_add_relu(res, sc, res_scale, res_shift, sc_scale, sc_shift, tile_target=TILE_M):
    m, c = res.shape
    tm = _pick_tile(m, tile_target)
    return pl.pallas_call(
        _bn_add_relu_kernel,
        grid=(m // tm,),
        in_specs=[
            pl.BlockSpec((tm, c), lambda i: (i, 0)),
            pl.BlockSpec((tm, c), lambda i: (i, 0)),
            pl.BlockSpec((1, c), lambda i: (0, 0)),
            pl.BlockSpec((1, c), lambda i: (0, 0)),
            pl.BlockSpec((1, c), lambda i: (0, 0)),
            pl.BlockSpec((1, c), lambda i: (0, 0)),
        ],
        out_specs=pl.BlockSpec((tm, c), lambda i: (i, 0)),
        out_shape=jax.ShapeDtypeStruct((m, c), jnp.float32),
        compiler_params=pltpu.CompilerParams(
            dimension_semantics=("parallel",),
            vmem_limit_bytes=VMEM_LIMIT),
    )(res, sc, res_scale, res_shift, sc_scale, sc_shift)


# ------------------------------ glue helpers -------------------------------- #

def _bn_affine(s_part, ss_part, count, gamma, beta):
    """Reduce per-tile partial sums and fold batch-BN into one FMA:
    scale = g * rsqrt(var+eps), shift = b - mean * scale."""
    s = jnp.sum(s_part, axis=0)
    ss = jnp.sum(ss_part, axis=0)
    mean = s / count
    var = jnp.maximum(ss / count - mean * mean, 0.0)     # clamp E[x^2]-E[x]^2
    scale = gamma * jax.lax.rsqrt(var + EPS)
    shift = beta - mean * scale
    return scale.reshape(1, -1), shift.reshape(1, -1)


# ------------------------------ module params ------------------------------- #

def init_params(key, in_channels, middle_channels, stride=1):
    expansion = 4
    out_channels = middle_channels * expansion
    ks = jax.random.split(key, 12)

    def conv_w(k, cin, co, kh=1, kw=1):
        fan_in = cin * kh * kw
        bound = 1.0 / jnp.sqrt(fan_in)
        return jax.random.uniform(k, (kh, kw, cin, co), jnp.float32, -bound, bound)

    params = {
        "w1": conv_w(ks[0], in_channels, middle_channels)[0, 0],        # (Cin, Cmid)
        "g1": 1.0 + 0.1 * jax.random.normal(ks[1], (middle_channels,), jnp.float32),
        "b1": 0.1 * jax.random.normal(ks[2], (middle_channels,), jnp.float32),
        "w2": conv_w(ks[3], middle_channels, middle_channels, 3, 3),     # (3,3,Cmid,Cmid)
        "g2": 1.0 + 0.1 * jax.random.normal(ks[4], (middle_channels,), jnp.float32),
        "b2": 0.1 * jax.random.normal(ks[5], (middle_channels,), jnp.float32),
        "w3": conv_w(ks[6], middle_channels, out_channels)[0, 0],        # (Cmid, Cout)
        "g3": 1.0 + 0.1 * jax.random.normal(ks[7], (out_channels,), jnp.float32),
        "b3": 0.1 * jax.random.normal(ks[8], (out_channels,), jnp.float32),
    }
    if stride != 1 or in_channels != out_channels:
        params["wsc"] = conv_w(ks[9], in_channels, out_channels)[0, 0]   # (Cin, Cout)
        params["gsc"] = 1.0 + 0.1 * jax.random.normal(ks[10], (out_channels,), jnp.float32)
        params["bsc"] = 0.1 * jax.random.normal(ks[11], (out_channels,), jnp.float32)
    return params


# ------------------------------ module forward ------------------------------ #

def bottleneck_forward(x_nchw, params, stride=1):
    assert stride == 1, "only stride=1 is supported"

    x = jnp.transpose(x_nchw, (0, 2, 3, 1)).astype(jnp.float32)   # NCHW -> NHWC
    n, h, w, cin = x.shape
    assert w % 8 == 0, "W must be a multiple of 8 (layout-clean im2col reshape)"
    cmid = params["w1"].shape[1]
    cout = params["w3"].shape[1]
    m = n * h * w
    x2d = x.reshape(m, cin)
    ones_in = jnp.ones((1, cin), jnp.float32)
    zeros_in = jnp.zeros((1, cin), jnp.float32)

    # conv1 (1x1) [+ fused projection-shortcut conv when present]
    if "wsc" in params:
        y1, ysc, s1, ss1, ssc, sssc = pw_conv_dual_stats(x2d, params["w1"], params["wsc"])
        scs, shs = _bn_affine(ssc, sssc, m, params["gsc"], params["bsc"])
        sc_in = ysc
    else:
        y1, s1, ss1 = pw_conv_stats(x2d, params["w1"], ones_in, zeros_in, pre_act=False)
        sc_in = x2d
        scs = jnp.ones((1, cout), jnp.float32)
        shs = jnp.zeros((1, cout), jnp.float32)
    sc1, sh1 = _bn_affine(s1, ss1, m, params["g1"], params["b1"])

    # conv2 (3x3, pad=1): BN1+ReLU applied in-kernel, 3-tap im2col, BN2 partial stats
    y2, s2, ss2 = conv3x3_stats(y1.reshape(n, h, w, cmid),
                                params["w2"].reshape(3, 3 * cmid, cmid), sc1, sh1)
    sc2, sh2 = _bn_affine(s2, ss2, m, params["g2"], params["b2"])

    # conv3 (1x1): BN2+ReLU applied in-kernel, BN3 partial stats
    y3, s3, ss3 = pw_conv_stats(y2.reshape(m, cmid), params["w3"], sc2, sh2, pre_act=True)
    sc3, sh3 = _bn_affine(s3, ss3, m, params["g3"], params["b3"])

    # fused BN3-apply + shortcut-BN-apply + add + ReLU
    out = bn_add_relu(y3, sc_in, sc3, sh3, scs, shs)
    return jnp.transpose(out.reshape(n, h, w, cout), (0, 3, 1, 2))        # NHWC -> NCHW


# ------------------------------ pure-JAX reference --------------------------- #
# Mirrors the kernel precision policy (bf16 MXU matmuls, bf16 inter-stage
# activations, batch-stat BN with stats taken from the f32 accumulator).

def reference_forward(x_nchw, params, stride=1):
    assert stride == 1
    x = jnp.transpose(x_nchw, (0, 2, 3, 1)).astype(jnp.float32)
    n, hh, ww, cin = x.shape

    def mm(a, wgt):
        a2 = a.astype(jnp.bfloat16).reshape(-1, a.shape[-1])
        y = jnp.dot(a2, wgt.astype(jnp.bfloat16), preferred_element_type=jnp.float32)
        return y.reshape(a.shape[:-1] + (wgt.shape[-1],))

    def bn_affine(y, g, b):
        cnt = y.shape[0] * y.shape[1] * y.shape[2]
        mean = jnp.sum(y, axis=(0, 1, 2)) / cnt
        var = jnp.maximum(jnp.sum(y * y, axis=(0, 1, 2)) / cnt - mean * mean, 0.0)
        scale = g * jax.lax.rsqrt(var + EPS)
        return scale, b - mean * scale

    # conv1 + BN1 + ReLU
    y1 = mm(x, params["w1"])
    sc1, sh1 = bn_affine(y1, params["g1"], params["b1"])
    h1 = jnp.maximum(y1.astype(jnp.bfloat16).astype(jnp.float32) * sc1 + sh1, 0.0)
    h1 = h1.astype(jnp.bfloat16)

    # conv2 (3x3, pad=1) + BN2 + ReLU
    cmid = h1.shape[-1]
    hp = jnp.pad(h1, ((0, 0), (1, 1), (1, 1), (0, 0)))
    acc = jnp.zeros((n, hh, ww, cmid), jnp.float32)
    for dy in range(3):
        for dx in range(3):
            t = hp[:, dy:dy + hh, dx:dx + ww, :]
            acc = acc + mm(t, params["w2"][dy, dx])
    sc2, sh2 = bn_affine(acc, params["g2"], params["b2"])
    h2 = jnp.maximum(acc.astype(jnp.bfloat16).astype(jnp.float32) * sc2 + sh2, 0.0)
    h2 = h2.astype(jnp.bfloat16)

    # conv3 + BN3
    y3 = mm(h2, params["w3"])
    sc3, sh3 = bn_affine(y3, params["g3"], params["b3"])
    res = y3.astype(jnp.bfloat16).astype(jnp.float32) * sc3 + sh3

    # shortcut
    if "wsc" in params:
        ysc = mm(x, params["wsc"])
        scs, shs = bn_affine(ysc, params["gsc"], params["bsc"])
        sc = ysc.astype(jnp.bfloat16).astype(jnp.float32) * scs + shs
    else:
        sc = x

    out = jnp.maximum(res + sc, 0.0)
    return jnp.transpose(out, (0, 3, 1, 2))


# ----------------------------------- main ----------------------------------- #

if __name__ == "__main__":
    key = jax.random.PRNGKey(0)

    # (N, C_in, H, W, C_mid): projection-shortcut (fused dual conv) paths and an
    # identity-shortcut path.
    configs = [
        (2, 4, 16, 16, 4),
        (4, 8, 16, 16, 8),
        (2, 16, 16, 16, 4),
    ]
    for idx, (n, cin, hh, ww, cmid) in enumerate(configs):
        k_x, k_p, key = jax.random.split(key, 3)
        x = jax.random.normal(k_x, (n, cin, hh, ww), jnp.float32)
        params = init_params(k_p, cin, cmid, stride=1)

        out = jax.block_until_ready(bottleneck_forward(x, params, stride=1))
        ref = jax.block_until_ready(reference_forward(x, params, stride=1))

        assert out.shape == (n, cmid * 4, hh, ww), (idx, out.shape)
        err = float(jnp.max(jnp.abs(out - ref)))
        assert err < 2e-2, f"config {idx}: max abs err {err}"

    print("KERNEL_OK")
</pallas_src>

<mosaic_0001>
module attributes {stable_mosaic.version = 11 : i64} {
  func.func @_pw_conv_dual_stats_kernel(%arg0: i32, %arg1: memref<512x4xf32, #tpu.memory_space<vmem>>, %arg2: memref<4x4xbf16, #tpu.memory_space<vmem>>, %arg3: memref<4x16xbf16, #tpu.memory_space<vmem>>, %arg4: memref<512x4xbf16, #tpu.memory_space<vmem>>, %arg5: memref<512x16xbf16, #tpu.memory_space<vmem>>, %arg6: memref<1x4xf32, #tpu.memory_space<vmem>>, %arg7: memref<1x4xf32, #tpu.memory_space<vmem>>, %arg8: memref<1x16xf32, #tpu.memory_space<vmem>>, %arg9: memref<1x16xf32, #tpu.memory_space<vmem>>) attributes {dimension_semantics = [#tpu.dimension_semantics<parallel>], iteration_bounds = array<i64: 1>, scalar_prefetch = 0 : i64, scratch_operands = 0 : i64, tpu.core_type = #tpu.core_type<tc>, window_params = [{transform_indices = @transform_0, window_bounds = array<i64: 512, 4>}, {pipeline_mode = #tpu.pipeline_mode<synchronous>, transform_indices = @transform_1, window_bounds = array<i64: 4, 4>}, {pipeline_mode = #tpu.pipeline_mode<synchronous>, transform_indices = @transform_2, window_bounds = array<i64: 4, 16>}, {transform_indices = @transform_3, window_bounds = array<i64: 512, 4>}, {transform_indices = @transform_4, window_bounds = array<i64: 512, 16>}, {transform_indices = @transform_5, window_bounds = array<i64: 1, 4>}, {transform_indices = @transform_6, window_bounds = array<i64: 1, 4>}, {transform_indices = @transform_7, window_bounds = array<i64: 1, 16>}, {transform_indices = @transform_8, window_bounds = array<i64: 1, 16>}]} {
    %c0 = arith.constant 0 : index
    %c0_0 = arith.constant 0 : index
    %0 = vector.load %arg1[%c0, %c0_0] : memref<512x4xf32, #tpu.memory_space<vmem>>, vector<512x4xf32>
    %1 = arith.truncf %0 : vector<512x4xf32> to vector<512x4xbf16>
    %c0_1 = arith.constant 0 : index
    %c0_2 = arith.constant 0 : index
    %2 = vector.load %arg2[%c0_1, %c0_2] : memref<4x4xbf16, #tpu.memory_space<vmem>>, vector<4x4xbf16>
    %cst = arith.constant dense<0.000000e+00> : vector<512x4xf32>
    %3 = tpu.matmul %1, %2, %cst {dimension_numbers = #tpu.dot_dimension_numbers<[1], [0], [0], [1], [0, 0, 1, 1], [], []>} : vector<512x4xbf16>, vector<4x4xbf16>, vector<512x4xf32> -> vector<512x4xf32>
    %c0_3 = arith.constant 0 : index
    %c0_4 = arith.constant 0 : index
    %4 = vector.load %arg3[%c0_3, %c0_4] : memref<4x16xbf16, #tpu.memory_space<vmem>>, vector<4x16xbf16>
    %cst_5 = arith.constant dense<0.000000e+00> : vector<512x16xf32>
    %5 = tpu.matmul %1, %4, %cst_5 {dimension_numbers = #tpu.dot_dimension_numbers<[1], [0], [0], [1], [0, 0, 1, 1], [], []>} : vector<512x4xbf16>, vector<4x16xbf16>, vector<512x16xf32> -> vector<512x16xf32>
    %6 = arith.truncf %3 : vector<512x4xf32> to vector<512x4xbf16>
    %c0_6 = arith.constant 0 : index
    %c0_7 = arith.constant 0 : index
    %7 = vector.load %arg4[%c0_6, %c0_7] : memref<512x4xbf16, #tpu.memory_space<vmem>>, vector<512x4xbf16>
    tpu.vector_store %arg4[%c0_6, %c0_7], %6 {strides = array<i32>} : memref<512x4xbf16, #tpu.memory_space<vmem>>, vector<512x4xbf16>,
    %8 = arith.truncf %5 : vector<512x16xf32> to vector<512x16xbf16>
    %c0_8 = arith.constant 0 : index
    %c0_9 = arith.constant 0 : index
    %9 = vector.load %arg5[%c0_8, %c0_9] : memref<512x16xbf16, #tpu.memory_space<vmem>>, vector<512x16xbf16>
    tpu.vector_store %arg5[%c0_8, %c0_9], %8 {strides = array<i32>} : memref<512x16xbf16, #tpu.memory_space<vmem>>, vector<512x16xbf16>,
    %cst_10 = arith.constant dense<0.000000e+00> : vector<4xf32>
    %10 = vector.multi_reduction <add>, %3, %cst_10 [0] : vector<512x4xf32> to vector<4xf32>
    %11 = vector.shape_cast %10 : vector<4xf32> to vector<1x4xf32>
    %c0_11 = arith.constant 0 : index
    %c0_12 = arith.constant 0 : index
    %12 = vector.load %arg6[%c0_11, %c0_12] : memref<1x4xf32, #tpu.memory_space<vmem>>, vector<1x4xf32>
    tpu.vector_store %arg6[%c0_11, %c0_12], %11 {strides = array<i32>} : memref<1x4xf32, #tpu.memory_space<vmem>>, vector<1x4xf32>,
    %13 = arith.mulf %3, %3 : vector<512x4xf32>
    %cst_13 = arith.constant dense<0.000000e+00> : vector<4xf32>
    %14 = vector.multi_reduction <add>, %13, %cst_13 [0] : vector<512x4xf32> to vector<4xf32>
    %15 = vector.shape_cast %14 : vector<4xf32> to vector<1x4xf32>
    %c0_14 = arith.constant 0 : index
    %c0_15 = arith.constant 0 : index
    %16 = vector.load %arg7[%c0_14, %c0_15] : memref<1x4xf32, #tpu.memory_space<vmem>>, vector<1x4xf32>
    tpu.vector_store %arg7[%c0_14, %c0_15], %15 {strides = array<i32>} : memref<1x4xf32, #tpu.memory_space<vmem>>, vector<1x4xf32>,
    %cst_16 = arith.constant dense<0.000000e+00> : vector<16xf32>
    %17 = vector.multi_reduction <add>, %5, %cst_16 [0] : vector<512x16xf32> to vector<16xf32>
    %18 = vector.shape_cast %17 : vector<16xf32> to vector<1x16xf32>
    %c0_17 = arith.constant 0 : index
    %c0_18 = arith.constant 0 : index
    %19 = vector.load %arg8[%c0_17, %c0_18] : memref<1x16xf32, #tpu.memory_space<vmem>>, vector<1x16xf32>
    tpu.vector_store %arg8[%c0_17, %c0_18], %18 {strides = array<i32>} : memref<1x16xf32, #tpu.memory_space<vmem>>, vector<1x16xf32>,
    %20 = arith.mulf %5, %5 : vector<512x16xf32>
    %cst_19 = arith.constant dense<0.000000e+00> : vector<16xf32>
    %21 = vector.multi_reduction <add>, %20, %cst_19 [0] : vector<512x16xf32> to vector<16xf32>
    %22 = vector.shape_cast %21 : vector<16xf32> to vector<1x16xf32>
    %c0_20 = arith.constant 0 : index
    %c0_21 = arith.constant 0 : index
    %23 = vector.load %arg9[%c0_20, %c0_21] : memref<1x16xf32, #tpu.memory_space<vmem>>, vector<1x16xf32>
    tpu.vector_store %arg9[%c0_20, %c0_21], %22 {strides = array<i32>} : memref<1x16xf32, #tpu.memory_space<vmem>>, vector<1x16xf32>,
    return
  }
  func.func @transform_0(%arg0: i32) -> (i32, i32) {
    %c0_i32 = arith.constant 0 : i32
    %c0_i32_0 = arith.constant 0 : i32
    return %arg0, %c0_i32 : i32, i32
  }
  func.func @transform_1(%arg0: i32) -> (i32, i32) {
    %c0_i32 = arith.constant 0 : i32
    %c0_i32_0 = arith.constant 0 : i32
    %c0_i32_1 = arith.constant 0 : i32
    return %c0_i32, %c0_i32_0 : i32, i32
  }
  func.func @transform_2(%arg0: i32) -> (i32, i32) {
    %c0_i32 = arith.constant 0 : i32
    %c0_i32_0 = arith.constant 0 : i32
    %c0_i32_1 = arith.constant 0 : i32
    return %c0_i32, %c0_i32_0 : i32, i32
  }
  func.func @transform_3(%arg0: i32) -> (i32, i32) {
    %c0_i32 = arith.constant 0 : i32
    %c0_i32_0 = arith.constant 0 : i32
    return %arg0, %c0_i32 : i32, i32
  }
  func.func @transform_4(%arg0: i32) -> (i32, i32) {
    %c0_i32 = arith.constant 0 : i32
    %c0_i32_0 = arith.constant 0 : i32
    return %arg0, %c0_i32 : i32, i32
  }
  func.func @transform_5(%arg0: i32) -> (i32, i32) {
    %c0_i32 = arith.constant 0 : i32
    %c0_i32_0 = arith.constant 0 : i32
    return %arg0, %c0_i32 : i32, i32
  }
  func.func @transform_6(%arg0: i32) -> (i32, i32) {
    %c0_i32 = arith.constant 0 : i32
    %c0_i32_0 = arith.constant 0 : i32
    return %arg0, %c0_i32 : i32, i32
  }
  func.func @transform_7(%arg0: i32) -> (i32, i32) {
    %c0_i32 = arith.constant 0 : i32
    %c0_i32_0 = arith.constant 0 : i32
    return %arg0, %c0_i32 : i32, i32
  }
  func.func @transform_8(%arg0: i32) -> (i32, i32) {
    %c0_i32 = arith.constant 0 : i32
    %c0_i32_0 = arith.constant 0 : i32
    return %arg0, %c0_i32 : i32, i32
  }
}

</mosaic_0001>

<bundles_post_ra>
// kernel: tpu_custom_call.1
= control target key start
LH: loop header
LB: loop body
LE: loop exit
PB: predicated region body
PF: predicated region fallthrough
CT: control target
= control target key end

     0   :  { %14 = vsyncpa [#allocation3], 0  ;;  %s4596_s0 = inlined_call_operand.vmem [shape: f32[512,4], index: 0, kind: input, shape index: {}]   ;;  %s4597_s1 = inlined_call_operand.vmem [shape: bf16[4,4], index: 1, kind: input, shape index: {}]   ;;  %s4598_s2 = inlined_call_operand.vmem [shape: bf16[4,16], index: 2, kind: input, shape index: {}]   ;;  %s4599_s3 = inlined_call_operand.vmem [shape: bf16[512,4], index: 3, kind: output, shape index: {0}]   ;;  %s4600_s4 = inlined_call_operand.vmem [shape: bf16[512,16], index: 4, kind: output, shape index: {1}]   ;;  %s4601_s5 = inlined_call_operand.hbm [shape: f32[1,4], index: 5, kind: output, shape index: {2}]   ;;  %s4602_s6 = inlined_call_operand.hbm [shape: f32[1,4], index: 6, kind: output, shape index: {3}]   ;;  %s4603_s7 = inlined_call_operand.hbm [shape: f32[1,16], index: 7, kind: output, shape index: {4}]   ;;  %s4604_s8 = inlined_call_operand.hbm [shape: f32[1,16], index: 8, kind: output, shape index: {5}]  }
   0x1   :  { %15 = vsyncpa [#allocation5], 0  ;;  %v120_v0 = vld [vmem:[%s4597_s1] sm:$0x3]  ;;  %vm218_vm0 = vcmask 1041408   ;;  %v25_v5 = vld [vmem:[%s4596_s0 + $0x8] sm:$0xff] }
   0x2   :  { %v511_v1 = vld [vmem:[%s4598_s2] sm:$0x3]  ;;  %2694 = vmatprep.subr.msk.bf16.mxu0 %vm218_vm0, %v120_v0  ;;  %v220_v3 = vsel %vm218_vm0, %v120_v0, 0  ;;  %vm121_vm1 = vcmask 31744   ;;  %v26_v6 = vld [vmem:[%s4596_s0 + $0x10] sm:$0xff]  ;;  %v27_v7 = vld [vmem:[%s4596_s0 + $0x18] sm:$0xff] }
   0x3   :  { %v24_v2 = vld [vmem:[%s4596_s0] sm:$0xff]  ;;  %2695 = vmatprep.subr.msk.bf16.mxu1 %vm218_vm0, %v511_v1  ;;  %v513_v4 = vsel %vm218_vm0, %v511_v1, 0  ;;  %2563 = vmatpush3.bf16.msra.mxu0 %v220_v3  ;;  %v89_v9 = vpack.c.bf16 %v27_v7, %v26_v6  ;;  %v29_v11 = vld [vmem:[%s4596_s0 + $0x28] sm:$0xff]  ;;  %v30_v13 = vld [vmem:[%s4596_s0 + $0x30] sm:$0xff] }
   0x4   :  { %2629 = vmatpush3.bf16.msra.mxu1 %v513_v4  ;;  %v88_v8 = vpack.c.bf16 %v25_v5, %v24_v2  ;;  %v28_v10 = vld [vmem:[%s4596_s0 + $0x20] sm:$0xff]  ;;  %v31_v14 = vld [vmem:[%s4596_s0 + $0x38] sm:$0xff]  ;;  %v33_v16 = vld [vmem:[%s4596_s0 + $0x48] sm:$0xff] }
   0x5   :  { %v90_v12 = vpack.c.bf16 %v29_v11, %v28_v10  ;;  %v32_v15 = vld [vmem:[%s4596_s0 + $0x40] sm:$0xff]  ;;  %v91_v17 = vpack.c.bf16 %v31_v14, %v30_v13  ;;  %v34_v19 = vld [vmem:[%s4596_s0 + $0x50] sm:$0xff]  ;;  %v35_v20 = vld [vmem:[%s4596_s0 + $0x58] sm:$0xff] }
   0x6   :  { %2564 = vmatprep.mubr.msk.bf16.mxu0 %vm121_vm1, %v88_v8  ;;  %2630 = vmatprep.mubr.msk.bf16.mxu1 %vm121_vm1, %v88_v8  ;;  %v92_v18 = vpack.c.bf16 %v33_v16, %v32_v15  ;;  %v36_v21 = vld [vmem:[%s4596_s0 + $0x60] sm:$0xff]  ;;  %v37_v22 = vld [vmem:[%s4596_s0 + $0x68] sm:$0xff]  ;;  %v93_v23 = vpack.c.bf16 %v35_v20, %v34_v19  ;;  %v38_v25 = vld [vmem:[%s4596_s0 + $0x70] sm:$0xff] }
   0x7   :  { %2565 = vmatmul.mubr.msk.bf16.vlgmr.msra.gmra.mxu0 %vm121_vm1, %v89_v9  ;;  %2631 = vmatmul.mubr.msk.bf16.vlgmr.msra.gmra.mxu1 %vm121_vm1, %v89_v9  ;;  %v94_v24 = vpack.c.bf16 %v37_v22, %v36_v21  ;;  %v39_v26 = vld [vmem:[%s4596_s0 + $0x78] sm:$0xff] }
   0x8   :  { %2568 = vmatprep.mubr.msk.bf16.mxu0 %vm121_vm1, %v90_v12  ;;  %2634 = vmatprep.mubr.msk.bf16.mxu1 %vm121_vm1, %v90_v12 }
   0xf   :  { %2569 = vmatmul.mubr.msk.bf16.gmra.mxu0 %vm121_vm1, %v91_v17  ;;  %2635 = vmatmul.mubr.msk.bf16.gmra.mxu1 %vm121_vm1, %v91_v17 }
  0x10   :  { %2572 = vmatprep.mubr.msk.bf16.mxu0 %vm121_vm1, %v92_v18  ;;  %2638 = vmatprep.mubr.msk.bf16.mxu1 %vm121_vm1, %v92_v18 }
  0x17   :  { %2573 = vmatmul.mubr.msk.bf16.gmra.mxu0 %vm121_vm1, %v93_v23  ;;  %2639 = vmatmul.mubr.msk.bf16.gmra.mxu1 %vm121_vm1, %v93_v23 }
  0x18   :  { %2576 = vmatprep.mubr.msk.bf16.mxu0 %vm121_vm1, %v94_v24  ;;  %2642 = vmatprep.mubr.msk.bf16.mxu1 %vm121_vm1, %v94_v24 }
  0x19   :  { %16 = vsyncpa [#allocation8], 0  ;;  %v40_v27 = vld [vmem:[%s4596_s0 + $0x80] sm:$0xff]  ;;  %v41_v28 = vld [vmem:[%s4596_s0 + $0x88] sm:$0xff]  ;;  %v95_v29 = vpack.c.bf16 %v39_v26, %v38_v25  ;;  %vm1060_vm2 = vcmask 27648   ;;  %vm1381_vm3 = vcmask 125952  }
  0x1a   :  { %v96_v30 = vpack.c.bf16 %v41_v28, %v40_v27  ;;  %v42_v31 = vld [vmem:[%s4596_s0 + $0x90] sm:$0xff]  ;;  %v43_v32 = vld [vmem:[%s4596_s0 + $0x98] sm:$0xff]  ;;  %v44_v33 = vld [vmem:[%s4596_s0 + $0xa0] sm:$0xff]  ;;  %vm1779_vm4 = vcmask 130048   ;;  %vm1579_vm5 = vcmask 24576   ;;  %s2787_s20 = smov [#allocation4]  }
  0x1b   :  { %v45_v34 = vld [vmem:[%s4596_s0 + $0xa8] sm:$0xff]  ;;  %v97_v35 = vpack.c.bf16 %v43_v32, %v42_v31  ;;  %v46_v37 = vld [vmem:[%s4596_s0 + $0xb0] sm:$0xff]  ;;  %v47_v38 = vld [vmem:[%s4596_s0 + $0xb8] sm:$0xff]  ;;  %s2133_s21 = sshll.u32 %s2787_s20, 4  ;;  %s2788_s22 = smov [#allocation6]   ;;  %vm1913_vm6 = vcmask 122880   ;;  %s2134_s21 = int_to_ptr.vmem [resolvable:$true] %s2133_s21 }
  0x1c   :  { %v98_v36 = vpack.c.bf16 %v45_v34, %v44_v33  ;;  %v48_v39 = vld [vmem:[%s4596_s0 + $0xc0] sm:$0xff]  ;;  %v49_v40 = vld [vmem:[%s4596_s0 + $0xc8] sm:$0xff]  ;;  %v99_v41 = vpack.c.bf16 %v47_v38, %v46_v37  ;;  %v50_v43 = vld [vmem:[%s4596_s0 + $0xd0] sm:$0xff]  ;;  %s2143_s23 = sshll.u32 %s2788_s22, 4  ;;  %s2789_s24 = smov [#allocation7]   ;;  %s4573_s23 = int_to_ptr.vmem [resolvable:$true] %s2143_s23 }
  0x1d   :  { %v100_v42 = vpack.c.bf16 %v49_v40, %v48_v39  ;;  %v51_v44 = vld [vmem:[%s4596_s0 + $0xd8] sm:$0xff]  ;;  %v52_v45 = vld [vmem:[%s4596_s0 + $0xe0] sm:$0xff]  ;;  %v53_v46 = vld [vmem:[%s4596_s0 + $0xe8] sm:$0xff]  ;;  %s2153_s25 = sshll.u32 %s2789_s24, 4  ;;  %s2154_s25 = int_to_ptr.vmem [resolvable:$true] %s2153_s25 }
  0x1e   :  { %v101_v47 = vpack.c.bf16 %v51_v44, %v50_v43  ;;  %v102_v48 = vpack.c.bf16 %v53_v46, %v52_v45  ;;  %v54_v49 = vld [vmem:[%s4596_s0 + $0xf0] sm:$0xff]  ;;  %v55_v50 = vld [vmem:[%s4596_s0 + $0xf8] sm:$0xff]  ;;  %v56_v51 = vld [vmem:[%s4596_s0 + $0x100] sm:$0xff] }
  0x1f   :  { %2577 = vmatmul.mubr.msk.bf16.gmra.mxu0 %vm121_vm1, %v95_v29  ;;  %2643 = vmatmul.mubr.msk.bf16.gmra.mxu1 %vm121_vm1, %v95_v29  ;;  %v57_v52 = vld [vmem:[%s4596_s0 + $0x108] sm:$0xff]  ;;  %v103_v53 = vpack.c.bf16 %v55_v50, %v54_v49  ;;  %v58_v55 = vld [vmem:[%s4596_s0 + $0x110] sm:$0xff]  ;;  %v59_v56 = vld [vmem:[%s4596_s0 + $0x118] sm:$0xff] }
  0x20   :  { %2580 = vmatprep.mubr.msk.bf16.mxu0 %vm121_vm1, %v96_v30  ;;  %2646 = vmatprep.mubr.msk.bf16.mxu1 %vm121_vm1, %v96_v30  ;;  %v104_v54 = vpack.c.bf16 %v57_v52, %v56_v51  ;;  %v60_v57 = vld [vmem:[%s4596_s0 + $0x120] sm:$0xff]  ;;  %v61_v58 = vld [vmem:[%s4596_s0 + $0x128] sm:$0xff]  ;;  %v105_v59 = vpack.c.bf16 %v59_v56, %v58_v55  ;;  %v62_v61 = vld [vmem:[%s4596_s0 + $0x130] sm:$0xff] }
  0x21   :  { %v106_v60 = vpack.c.bf16 %v61_v58, %v60_v57  ;;  %v63_v62 = vld [vmem:[%s4596_s0 + $0x138] sm:$0xff]  ;;  %v64_v63 = vld [vmem:[%s4596_s0 + $0x140] sm:$0xff]  ;;  %v65_v0 = vld [vmem:[%s4596_s0 + $0x148] sm:$0xff] }
  0x22   :  { %v107_v1 = vpack.c.bf16 %v63_v62, %v62_v61  ;;  %v108_v2 = vpack.c.bf16 %v65_v0, %v64_v63  ;;  %v66_v3 = vld [vmem:[%s4596_s0 + $0x150] sm:$0xff]  ;;  %v67_v4 = vld [vmem:[%s4596_s0 + $0x158] sm:$0xff]  ;;  %v68_v5 = vld [vmem:[%s4596_s0 + $0x160] sm:$0xff] }
  0x23   :  { %v69_v6 = vld [vmem:[%s4596_s0 + $0x168] sm:$0xff]  ;;  %v109_v7 = vpack.c.bf16 %v67_v4, %v66_v3  ;;  %v70_v9 = vld [vmem:[%s4596_s0 + $0x170] sm:$0xff]  ;;  %v71_v10 = vld [vmem:[%s4596_s0 + $0x178] sm:$0xff] }
  0x24   :  { %v110_v8 = vpack.c.bf16 %v69_v6, %v68_v5  ;;  %v72_v11 = vld [vmem:[%s4596_s0 + $0x180] sm:$0xff]  ;;  %v73_v12 = vld [vmem:[%s4596_s0 + $0x188] sm:$0xff]  ;;  %v111_v13 = vpack.c.bf16 %v71_v10, %v70_v9  ;;  %v74_v15 = vld [vmem:[%s4596_s0 + $0x190] sm:$0xff] }
  0x25   :  { %v112_v14 = vpack.c.bf16 %v73_v12, %v72_v11  ;;  %v75_v16 = vld [vmem:[%s4596_s0 + $0x198] sm:$0xff]  ;;  %v76_v17 = vld [vmem:[%s4596_s0 + $0x1a0] sm:$0xff]  ;;  %v77_v18 = vld [vmem:[%s4596_s0 + $0x1a8] sm:$0xff] }
  0x26   :  { %v113_v19 = vpack.c.bf16 %v75_v16, %v74_v15  ;;  %v114_v20 = vpack.c.bf16 %v77_v18, %v76_v17  ;;  %v78_v21 = vld [vmem:[%s4596_s0 + $0x1b0] sm:$0xff]  ;;  %v79_v22 = vld [vmem:[%s4596_s0 + $0x1b8] sm:$0xff]  ;;  %v80_v23 = vld [vmem:[%s4596_s0 + $0x1c0] sm:$0xff] }
  0x27   :  { %2581 = vmatmul.mubr.msk.bf16.gmra.mxu0 %vm121_vm1, %v97_v35  ;;  %2647 = vmatmul.mubr.msk.bf16.gmra.mxu1 %vm121_vm1, %v97_v35  ;;  %v81_v24 = vld [vmem:[%s4596_s0 + $0x1c8] sm:$0xff]  ;;  %v115_v25 = vpack.c.bf16 %v79_v22, %v78_v21  ;;  %v82_v27 = vld [vmem:[%s4596_s0 + $0x1d0] sm:$0xff]  ;;  %v83_v28 = vld [vmem:[%s4596_s0 + $0x1d8] sm:$0xff] }
  0x28   :  { %2584 = vmatprep.mubr.msk.bf16.mxu0 %vm121_vm1, %v98_v36  ;;  %2650 = vmatprep.mubr.msk.bf16.mxu1 %vm121_vm1, %v98_v36  ;;  %v116_v26 = vpack.c.bf16 %v81_v24, %v80_v23  ;;  %v84_v29 = vld [vmem:[%s4596_s0 + $0x1e0] sm:$0xff]  ;;  %v85_v30 = vld [vmem:[%s4596_s0 + $0x1e8] sm:$0xff]  ;;  %v117_v31 = vpack.c.bf16 %v83_v28, %v82_v27  ;;  %v86_v33 = vld [vmem:[%s4596_s0 + $0x1f0] sm:$0xff] }
  0x29   :  { %v118_v32 = vpack.c.bf16 %v85_v30, %v84_v29  ;;  %v87_v34 = vld [vmem:[%s4596_s0 + $0x1f8] sm:$0xff] }
  0x2a   :  { %v119_v35 = vpack.c.bf16 %v87_v34, %v86_v33 }
  0x2f   :  { %2585 = vmatmul.mubr.msk.bf16.gmra.mxu0 %vm121_vm1, %v99_v41  ;;  %2651 = vmatmul.mubr.msk.bf16.gmra.mxu1 %vm121_vm1, %v99_v41 }
  0x30   :  { %2588 = vmatprep.mubr.msk.bf16.mxu0 %vm121_vm1, %v100_v42  ;;  %2654 = vmatprep.mubr.msk.bf16.mxu1 %vm121_vm1, %v100_v42 }
  0x37   :  { %2589 = vmatmul.mubr.msk.bf16.gmra.mxu0 %vm121_vm1, %v101_v47  ;;  %2655 = vmatmul.mubr.msk.bf16.gmra.mxu1 %vm121_vm1, %v101_v47 }
  0x38   :  { %2592 = vmatprep.mubr.msk.bf16.mxu0 %vm121_vm1, %v102_v48  ;;  %2658 = vmatprep.mubr.msk.bf16.mxu1 %vm121_vm1, %v102_v48 }
  0x3f   :  { %2593 = vmatmul.mubr.msk.bf16.gmra.mxu0 %vm121_vm1, %v103_v53  ;;  %2659 = vmatmul.mubr.msk.bf16.gmra.mxu1 %vm121_vm1, %v103_v53 }
  0x40   :  { %2596 = vmatprep.mubr.msk.bf16.mxu0 %vm121_vm1, %v104_v54  ;;  %2662 = vmatprep.mubr.msk.bf16.mxu1 %vm121_vm1, %v104_v54 }
  0x47   :  { %2597 = vmatmul.mubr.msk.bf16.gmra.mxu0 %vm121_vm1, %v105_v59  ;;  %2663 = vmatmul.mubr.msk.bf16.gmra.mxu1 %vm121_vm1, %v105_v59 }
  0x48   :  { %2600 = vmatprep.mubr.msk.bf16.mxu0 %vm121_vm1, %v106_v60  ;;  %2666 = vmatprep.mubr.msk.bf16.mxu1 %vm121_vm1, %v106_v60 }
  0x4f   :  { %2601 = vmatmul.mubr.msk.bf16.gmra.mxu0 %vm121_vm1, %v107_v1  ;;  %2667 = vmatmul.mubr.msk.bf16.gmra.mxu1 %vm121_vm1, %v107_v1 }
  0x50   :  { %2604 = vmatprep.mubr.msk.bf16.mxu0 %vm121_vm1, %v108_v2  ;;  %2670 = vmatprep.mubr.msk.bf16.mxu1 %vm121_vm1, %v108_v2 }
  0x57   :  { %2605 = vmatmul.mubr.msk.bf16.gmra.mxu0 %vm121_vm1, %v109_v7  ;;  %2671 = vmatmul.mubr.msk.bf16.gmra.mxu1 %vm121_vm1, %v109_v7 }
  0x58   :  { %2608 = vmatprep.mubr.msk.bf16.mxu0 %vm121_vm1, %v110_v8  ;;  %2674 = vmatprep.mubr.msk.bf16.mxu1 %vm121_vm1, %v110_v8 }
  0x5f   :  { %2609 = vmatmul.mubr.msk.bf16.gmra.mxu0 %vm121_vm1, %v111_v13  ;;  %2675 = vmatmul.mubr.msk.bf16.gmra.mxu1 %vm121_vm1, %v111_v13 }
  0x60   :  { %2612 = vmatprep.mubr.msk.bf16.mxu0 %vm121_vm1, %v112_v14  ;;  %2678 = vmatprep.mubr.msk.bf16.mxu1 %vm121_vm1, %v112_v14 }
  0x67   :  { %2613 = vmatmul.mubr.msk.bf16.gmra.mxu0 %vm121_vm1, %v113_v19  ;;  %2679 = vmatmul.mubr.msk.bf16.gmra.mxu1 %vm121_vm1, %v113_v19 }
  0x68   :  { %2616 = vmatprep.mubr.msk.bf16.mxu0 %vm121_vm1, %v114_v20  ;;  %2682 = vmatprep.mubr.msk.bf16.mxu1 %vm121_vm1, %v114_v20 }
  0x6f   :  { %2617 = vmatmul.mubr.msk.bf16.gmra.mxu0 %vm121_vm1, %v115_v25  ;;  %2683 = vmatmul.mubr.msk.bf16.gmra.mxu1 %vm121_vm1, %v115_v25 }
  0x70   :  { %2620 = vmatprep.mubr.msk.bf16.mxu0 %vm121_vm1, %v116_v26  ;;  %2686 = vmatprep.mubr.msk.bf16.mxu1 %vm121_vm1, %v116_v26 }
  0x77   :  { %2621 = vmatmul.mubr.msk.bf16.gmra.mxu0 %vm121_vm1, %v117_v31  ;;  %2687 = vmatmul.mubr.msk.bf16.gmra.mxu1 %vm121_vm1, %v117_v31 }
  0x78   :  { %2624 = vmatprep.mubr.msk.bf16.mxu0 %vm121_vm1, %v118_v32  ;;  %2690 = vmatprep.mubr.msk.bf16.mxu1 %vm121_vm1, %v118_v32 }
  0x7f   :  { %2625 = vmatmul.mubr.msk.bf16.gmra.mxu0 %vm121_vm1, %v119_v35  ;;  %2691 = vmatmul.mubr.msk.bf16.gmra.mxu1 %vm121_vm1, %v119_v35 }
  0xc7   :  { %v2566_v36 = vpop.f32.mrf.mxu0  ;;  %v2632_v37 = vpop.f32.mrf.mxu1 }
  0xc8   :  { %v2370_v38 = vpack.c.bf16 %v2566_v36, %v2566_v36  ;;  %v1583_v39 = vmul.f32 %v2566_v36, %v2566_v36  ;;  %v2434_v40 = vpack.c.bf16 %v2632_v37, %v2632_v37  ;;  %v1449_v45 = vsel %vm121_vm1, %v2566_v36, 0.0 }
  0xc9   :  { %v256_v41 = vpop.f32.mrf.mxu0  ;;  %v549_v42 = vpop.f32.mrf.mxu1  ;;  %v1783_v50 = vsel %vm1779_vm4, %v2632_v37, 0.0  ;;  %v1917_v51 = vmul.f32 %v2632_v37, %v2632_v37 }
  0xca   :  { %1063 = vst.msk [vmem:[%s4599_s3 + $0x8] sm:$0xf] %vm1060_vm2, %v2370_v38  ;;  %v2368_v43 = vpack.c.bf16 %v256_v41, %v256_v41  ;;  %v1581_v44 = vmul.f32 %v256_v41, %v256_v41  ;;  %v2432_v46 = vpack.c.bf16 %v549_v42, %v549_v42  ;;  %v1648_v49 = vsel %vm121_vm1, %v1583_v39, 0.0 }
  0xcb   :  { %1384 = vst.msk [vmem:[%s4600_s4 + $0x8] sm:$0xf] %vm1381_vm3, %v2434_v40  ;;  %v2567_v47 = vpop.f32.mrf.mxu0  ;;  %v2633_v48 = vpop.f32.mrf.mxu1  ;;  %v1446_v53 = vsel %vm121_vm1, %v256_v41, 0.0  ;;  %v1780_v54 = vsel %vm1779_vm4, %v549_v42, 0.0  ;;  %v1915_v55 = vmul.f32 %v549_v42, %v549_v42  ;;  %v1982_v9 = vsel %vm1779_vm4, %v1917_v51, 0.0 }
  0xcc   :  { %1061 = vst.msk [vmem:[%s4599_s3] sm:$0xf] %vm1060_vm2, %v2368_v43  ;;  %v2371_v52 = vpack.c.bf16 %v2567_v47, %v2567_v47  ;;  %v2435_v56 = vpack.c.bf16 %v2633_v48, %v2633_v48  ;;  %v1645_v59 = vsel %vm121_vm1, %v1581_v44, 0.0  ;;  %v1584_v63 = vmul.f32 %v2567_v47, %v2567_v47 }
  0xcd   :  { %1382 = vst.msk [vmem:[%s4600_s4] sm:$0xf] %vm1381_vm3, %v2432_v46  ;;  %v259_v57 = vpop.f32.mrf.mxu0  ;;  %v552_v58 = vpop.f32.mrf.mxu1  ;;  %v1979_v10 = vsel %vm1779_vm4, %v1915_v55, 0.0  ;;  %v1918_v15 = vmul.f32 %v2633_v48, %v2633_v48  ;;  %v1451_v19 = vsel %vm121_vm1, %v2567_v47, 0.0  ;;  %v1785_v20 = vsel %vm1779_vm4, %v2633_v48, 0.0 }
  0xce   :  { %1064 = vst.msk [vmem:[%s4599_s3 + $0xc] sm:$0xf] %vm1060_vm2, %v2371_v52  ;;  %v2369_v60 = vpack.c.bf16 %v259_v57, %v259_v57  ;;  %v1447_v61 = vsel %vm121_vm1, %v259_v57, 0.0  ;;  %v1582_v62 = vmul.f32 %v259_v57, %v259_v57  ;;  %v2433_v1 = vpack.c.bf16 %v552_v58, %v552_v58 }
  0xcf   :  { %1385 = vst.msk [vmem:[%s4600_s4 + $0xc] sm:$0xf] %vm1381_vm3, %v2435_v56  ;;  %v1448_v0 = vadd.f32 %v1447_v61, %v1446_v53  ;;  %v1781_v2 = vsel %vm1779_vm4, %v552_v58, 0.0  ;;  %v2570_v3 = vpop.f32.mrf.mxu0  ;;  %v2636_v4 = vpop.f32.mrf.mxu1  ;;  %v1916_v7 = vmul.f32 %v552_v58, %v552_v58  ;;  %v1650_v25 = vsel %vm121_vm1, %v1584_v63, 0.0 }
  0xd0   :  { %1062 = vst.msk [vmem:[%s4599_s3 + $0x4] sm:$0xf] %vm1060_vm2, %v2369_v60  ;;  %v1646_v5 = vsel %vm121_vm1, %v1582_v62, 0.0  ;;  %v1782_v6 = vadd.f32 %v1781_v2, %v1780_v54  ;;  %v2374_v8 = vpack.c.bf16 %v2570_v3, %v2570_v3  ;;  %v2438_v18 = vpack.c.bf16 %v2636_v4, %v2636_v4 }
  0xd1   :  { %v1450_v11 = vadd.f32 %v1449_v45, %v1448_v0  ;;  %v1647_v12 = vadd.f32 %v1646_v5, %v1645_v59  ;;  %1383 = vst.msk [vmem:[%s4600_s4 + $0x4] sm:$0xf] %vm1381_vm3, %v2433_v1  ;;  %v272_v13 = vpop.f32.mrf.mxu0  ;;  %v565_v14 = vpop.f32.mrf.mxu1  ;;  %v1980_v17 = vsel %vm1779_vm4, %v1916_v7, 0.0  ;;  %v1984_v35 = vsel %vm1779_vm4, %v1918_v15, 0.0 }
  0xd2   :  { %v1784_v16 = vadd.f32 %v1783_v50, %v1782_v6  ;;  %1067 = vst.msk [vmem:[%s4599_s3 + $0x18] sm:$0xf] %vm1060_vm2, %v2374_v8  ;;  %v1981_v22 = vadd.f32 %v1980_v17, %v1979_v10  ;;  %v2372_v26 = vpack.c.bf16 %v272_v13, %v272_v13  ;;  %v1585_v28 = vmul.f32 %v272_v13, %v272_v13 }
  0xd3   :  { %v1649_v21 = vadd.f32 %v1648_v49, %v1647_v12  ;;  %v3147_v23 = vpop.f32.mrf.mxu0  ;;  %v3149_v24 = vpop.f32.mrf.mxu1  ;;  %1388 = vst.msk [vmem:[%s4600_s4 + $0x18] sm:$0xf] %vm1381_vm3, %v2438_v18  ;;  %v1452_v27 = vadd.f32 %v1451_v19, %v1450_v11  ;;  %v1453_v30 = vsel %vm121_vm1, %v272_v13, 0.0  ;;  %v2436_v32 = vpack.c.bf16 %v565_v14, %v565_v14 }
  0xd4   :  { %v1983_v29 = vadd.f32 %v1982_v9, %v1981_v22  ;;  %v1457_v36 = vsel %vm121_vm1, %v2570_v3, 0.0  ;;  %1065 = vst.msk [vmem:[%s4599_s3 + $0x10] sm:$0xf] %vm1060_vm2, %v2372_v26  ;;  %v1786_v38 = vadd.f32 %v1785_v20, %v1784_v16  ;;  %v1787_v39 = vsel %vm1779_vm4, %v565_v14, 0.0 }
  0xd5   :  { %v1651_v31 = vadd.f32 %v1650_v25, %v1649_v21  ;;  %v275_v33 = vpop.f32.mrf.mxu0  ;;  %v568_v34 = vpop.f32.mrf.mxu1  ;;  %v1454_v37 = vadd.f32 %v1453_v30, %v1452_v27  ;;  %1386 = vst.msk [vmem:[%s4600_s4 + $0x10] sm:$0xf] %vm1381_vm3, %v2436_v32  ;;  %v1919_v40 = vmul.f32 %v565_v14, %v565_v14  ;;  %v2375_v42 = vpack.c.bf16 %v3147_v23, %v3147_v23 }
  0xd6   :  { %v1985_v41 = vadd.f32 %v1984_v35, %v1983_v29  ;;  %v1587_v45 = vmul.f32 %v2570_v3, %v2570_v3  ;;  %v1652_v46 = vsel %vm121_vm1, %v1585_v28, 0.0  ;;  %v1788_v47 = vadd.f32 %v1787_v39, %v1786_v38 }
  0xd7   :  { %v3170_v43 = vpop.f32.mrf.mxu0  ;;  %v3172_v44 = vpop.f32.mrf.mxu1  ;;  %v2439_v48 = vpack.c.bf16 %v3149_v24, %v3149_v24  ;;  %v1791_v49 = vsel %vm1779_vm4, %v2636_v4, 0.0  ;;  %v1921_v50 = vmul.f32 %v2636_v4, %v2636_v4  ;;  %v1653_v51 = vadd.f32 %v1652_v46, %v1651_v31  ;;  %1068 = vst.msk [vmem:[%s4599_s3 + $0x1c] sm:$0xf] %vm1060_vm2, %v2375_v42 }
  0xd8   :  { %v2373_v52 = vpack.c.bf16 %v275_v33, %v275_v33  ;;  %v1986_v55 = vsel %vm1779_vm4, %v1919_v40, 0.0  ;;  %v1588_v56 = vmul.f32 %v3147_v23, %v3147_v23  ;;  %v1455_v57 = vsel %vm121_vm1, %v275_v33, 0.0 }
  0xd9   :  { %v288_v53 = vpop.f32.mrf.mxu0  ;;  %v581_v54 = vpop.f32.mrf.mxu1  ;;  %1389 = vst.msk [vmem:[%s4600_s4 + $0x1c] sm:$0xf] %vm1381_vm3, %v2439_v48  ;;  %v1586_v58 = vmul.f32 %v275_v33, %v275_v33  ;;  %v1987_v59 = vadd.f32 %v1986_v55, %v1985_v41  ;;  %v1456_v60 = vadd.f32 %v1455_v57, %v1454_v37  ;;  %v2437_v61 = vpack.c.bf16 %v568_v34, %v568_v34 }
  0xda   :  { %1066 = vst.msk [vmem:[%s4599_s3 + $0x14] sm:$0xf] %vm1060_vm2, %v2373_v52  ;;  %v1789_v62 = vsel %vm1779_vm4, %v568_v34, 0.0  ;;  %v1920_v3 = vmul.f32 %v568_v34, %v568_v34  ;;  %v2378_v4 = vpack.c.bf16 %v3170_v43, %v3170_v43  ;;  %v1656_v5 = vsel %vm121_vm1, %v1587_v45, 0.0 }
  0xdb   :  { %v3195_v63 = vpop.f32.mrf.mxu0  ;;  %v3197_v0 = vpop.f32.mrf.mxu1  ;;  %v1654_v1 = vsel %vm121_vm1, %v1586_v58, 0.0  ;;  %v1790_v2 = vadd.f32 %v1789_v62, %v1788_v47  ;;  %v1990_v6 = vsel %vm1779_vm4, %v1921_v50, 0.0  ;;  %v1458_v7 = vadd.f32 %v1457_v36, %v1456_v60  ;;  %1387 = vst.msk [vmem:[%s4600_s4 + $0x14] sm:$0xf] %vm1381_vm3, %v2437_v61 }
  0xdc   :  { %v1655_v8 = vadd.f32 %v1654_v1, %v1653_v51  ;;  %v1922_v11 = vmul.f32 %v3149_v24, %v3149_v24  ;;  %v1988_v13 = vsel %vm1779_vm4, %v1920_v3, 0.0  ;;  %1071 = vst.msk [vmem:[%s4599_s3 + $0x28] sm:$0xf] %vm1060_vm2, %v2378_v4  ;;  %v2442_v14 = vpack.c.bf16 %v3172_v44, %v3172_v44 }
  0xdd   :  { %v291_v9 = vpop.f32.mrf.mxu0  ;;  %v3208_v10 = vpop.f32.mrf.mxu1  ;;  %v1792_v12 = vadd.f32 %v1791_v49, %v1790_v2  ;;  %v1459_v15 = vsel %vm121_vm1, %v3147_v23, 0.0  ;;  %v1793_v16 = vsel %vm1779_vm4, %v3149_v24, 0.0  ;;  %v1989_v18 = vadd.f32 %v1988_v13, %v1987_v59 }
  0xde   :  { %v1657_v17 = vadd.f32 %v1656_v5, %v1655_v8  ;;  %v1658_v21 = vsel %vm121_vm1, %v1588_v56, 0.0  ;;  %1392 = vst.msk [vmem:[%s4600_s4 + $0x28] sm:$0xf] %vm1381_vm3, %v2442_v14  ;;  %v2376_v22 = vpack.c.bf16 %v288_v53, %v288_v53  ;;  %v1460_v25 = vadd.f32 %v1459_v15, %v1458_v7 }
  0xdf   :  { %v3223_v19 = vpop.f32.mrf.mxu0  ;;  %v3225_v20 = vpop.f32.mrf.mxu1  ;;  %v1589_v26 = vmul.f32 %v288_v53, %v288_v53  ;;  %v1991_v23 = vadd.f32 %v1990_v6, %v1989_v18  ;;  %v1461_v27 = vsel %vm121_vm1, %v288_v53, 0.0  ;;  %v2440_v28 = vpack.c.bf16 %v581_v54, %v581_v54 }
  0xe0   :  { %v1659_v24 = vadd.f32 %v1658_v21, %v1657_v17  ;;  %v1992_v31 = vsel %vm1779_vm4, %v1922_v11, 0.0  ;;  %v1465_v32 = vsel %vm121_vm1, %v3170_v43, 0.0  ;;  %1069 = vst.msk [vmem:[%s4599_s3 + $0x20] sm:$0xf] %vm1060_vm2, %v2376_v22  ;;  %v1462_v33 = vadd.f32 %v1461_v27, %v1460_v25 }
  0xe1   :  { %v3233_v29 = vpop.f32.mrf.mxu0  ;;  %v3235_v30 = vpop.f32.mrf.mxu1  ;;  %v1794_v34 = vadd.f32 %v1793_v16, %v1792_v12  ;;  %1390 = vst.msk [vmem:[%s4600_s4 + $0x20] sm:$0xf] %vm1381_vm3, %v2440_v28  ;;  %v1795_v35 = vsel %vm1779_vm4, %v581_v54, 0.0  ;;  %v1923_v36 = vmul.f32 %v581_v54, %v581_v54  ;;  %v1993_v37 = vadd.f32 %v1992_v31, %v1991_v23 }
  0xe2   :  { %v2379_v38 = vpack.c.bf16 %v3195_v63, %v3195_v63  ;;  %v1591_v41 = vmul.f32 %v3170_v43, %v3170_v43  ;;  %v1660_v42 = vsel %vm121_vm1, %v1589_v26, 0.0  ;;  %v2443_v46 = vpack.c.bf16 %v3197_v0, %v3197_v0 }
  0xe3   :  { %v3251_v39 = vpop.f32.mrf.mxu0  ;;  %v3253_v40 = vpop.f32.mrf.mxu1  ;;  %v1796_v45 = vadd.f32 %v1795_v35, %v1794_v34  ;;  %v1799_v47 = vsel %vm1779_vm4, %v3172_v44, 0.0  ;;  %v1925_v48 = vmul.f32 %v3172_v44, %v3172_v44  ;;  %v1661_v49 = vadd.f32 %v1660_v42, %v1659_v24 }
  0xe4   :  { %1072 = vst.msk [vmem:[%s4599_s3 + $0x2c] sm:$0xf] %vm1060_vm2, %v2379_v38  ;;  %v2377_v50 = vpack.c.bf16 %v291_v9, %v291_v9  ;;  %v1994_v52 = vsel %vm1779_vm4, %v1923_v36, 0.0  ;;  %v1592_v53 = vmul.f32 %v3195_v63, %v3195_v63  ;;  %v1463_v44 = vsel %vm121_vm1, %v291_v9, 0.0 }
  0xe5   :  { %v3268_v43 = vpop.f32.mrf.mxu0  ;;  %v3270_v51 = vpop.f32.mrf.mxu1  ;;  %1393 = vst.msk [vmem:[%s4600_s4 + $0x2c] sm:$0xf] %vm1381_vm3, %v2443_v46  ;;  %v1590_v54 = vmul.f32 %v291_v9, %v291_v9  ;;  %v1995_v55 = vadd.f32 %v1994_v52, %v1993_v37  ;;  %v1464_v56 = vadd.f32 %v1463_v44, %v1462_v33  ;;  %v2441_v57 = vpack.c.bf16 %v3208_v10, %v3208_v10 }
  0xe6   :  { %1070 = vst.msk [vmem:[%s4599_s3 + $0x24] sm:$0xf] %vm1060_vm2, %v2377_v50  ;;  %v1797_v58 = vsel %vm1779_vm4, %v3208_v10, 0.0  ;;  %v1924_v1 = vmul.f32 %v3208_v10, %v3208_v10  ;;  %v2382_v2 = vpack.c.bf16 %v3223_v19, %v3223_v19  ;;  %v1664_v3 = vsel %vm121_vm1, %v1591_v41, 0.0 }
  0xe7   :  { %v3288_v59 = vpop.f32.mrf.mxu0  ;;  %v3290_v60 = vpop.f32.mrf.mxu1  ;;  %v1662_v61 = vsel %vm121_vm1, %v1590_v54, 0.0  ;;  %v1798_v62 = vadd.f32 %v1797_v58, %v1796_v45  ;;  %v1998_v4 = vsel %vm1779_vm4, %v1925_v48, 0.0  ;;  %v1466_v5 = vadd.f32 %v1465_v32, %v1464_v56  ;;  %1391 = vst.msk [vmem:[%s4600_s4 + $0x24] sm:$0xf] %vm1381_vm3, %v2441_v57 }
  0xe8   :  { %v1663_v6 = vadd.f32 %v1662_v61, %v1661_v49  ;;  %v1926_v9 = vmul.f32 %v3197_v0, %v3197_v0  ;;  %v1996_v11 = vsel %vm1779_vm4, %v1924_v1, 0.0  ;;  %1075 = vst.msk [vmem:[%s4599_s3 + $0x38] sm:$0xf] %vm1060_vm2, %v2382_v2  ;;  %v2446_v12 = vpack.c.bf16 %v3225_v20, %v3225_v20 }
  0xe9   :  { %v3303_v7 = vpop.f32.mrf.mxu0  ;;  %v3305_v8 = vpop.f32.mrf.mxu1  ;;  %v1800_v10 = vadd.f32 %v1799_v47, %v1798_v62  ;;  %v1467_v13 = vsel %vm121_vm1, %v3195_v63, 0.0  ;;  %v1801_v14 = vsel %vm1779_vm4, %v3197_v0, 0.0  ;;  %v1997_v16 = vadd.f32 %v1996_v11, %v1995_v55 }
  0xea   :  { %v1665_v15 = vadd.f32 %v1664_v3, %v1663_v6  ;;  %v1666_v21 = vsel %vm121_vm1, %v1592_v53, 0.0  ;;  %1396 = vst.msk [vmem:[%s4600_s4 + $0x38] sm:$0xf] %vm1381_vm3, %v2446_v12  ;;  %v2380_v22 = vpack.c.bf16 %v3233_v29, %v3233_v29  ;;  %v1468_v63 = vadd.f32 %v1467_v13, %v1466_v5 }
  0xeb   :  { %v3320_v17 = vpop.f32.mrf.mxu0  ;;  %v3322_v18 = vpop.f32.mrf.mxu1  ;;  %v1593_v0 = vmul.f32 %v3233_v29, %v3233_v29  ;;  %v1999_v25 = vadd.f32 %v1998_v4, %v1997_v16  ;;  %v1469_v26 = vsel %vm121_vm1, %v3233_v29, 0.0  ;;  %v2444_v27 = vpack.c.bf16 %v3235_v30, %v3235_v30 }
  0xec   :  { %v1667_v23 = vadd.f32 %v1666_v21, %v1665_v15  ;;  %v2000_v31 = vsel %vm1779_vm4, %v1926_v9, 0.0  ;;  %v1473_v32 = vsel %vm121_vm1, %v3223_v19, 0.0  ;;  %1073 = vst.msk [vmem:[%s4599_s3 + $0x30] sm:$0xf] %vm1060_vm2, %v2380_v22  ;;  %v1470_v33 = vadd.f32 %v1469_v26, %v1468_v63 }
  0xed   :  { %v3337_v24 = vpop.f32.mrf.mxu0  ;;  %v3339_v28 = vpop.f32.mrf.mxu1  ;;  %v1802_v29 = vadd.f32 %v1801_v14, %v1800_v10  ;;  %1394 = vst.msk [vmem:[%s4600_s4 + $0x30] sm:$0xf] %vm1381_vm3, %v2444_v27  ;;  %v1803_v34 = vsel %vm1779_vm4, %v3235_v30, 0.0  ;;  %v1927_v35 = vmul.f32 %v3235_v30, %v3235_v30  ;;  %v2001_v36 = vadd.f32 %v2000_v31, %v1999_v25 }
  0xee   :  { %v2383_v37 = vpack.c.bf16 %v3251_v39, %v3251_v39  ;;  %v1595_v42 = vmul.f32 %v3223_v19, %v3223_v19  ;;  %v1668_v45 = vsel %vm121_vm1, %v1593_v0, 0.0  ;;  %v2447_v47 = vpack.c.bf16 %v3253_v40, %v3253_v40 }
  0xef   :  { %v3358_v38 = vpop.f32.mrf.mxu0  ;;  %v3360_v41 = vpop.f32.mrf.mxu1  ;;  %v1804_v46 = vadd.f32 %v1803_v34, %v1802_v29  ;;  %v1807_v30 = vsel %vm1779_vm4, %v3225_v20, 0.0  ;;  %v1929_v48 = vmul.f32 %v3225_v20, %v3225_v20  ;;  %v1669_v49 = vadd.f32 %v1668_v45, %v1667_v23 }
  0xf0   :  { %1076 = vst.msk [vmem:[%s4599_s3 + $0x3c] sm:$0xf] %vm1060_vm2, %v2383_v37  ;;  %v2381_v19 = vpack.c.bf16 %v3268_v43, %v3268_v43  ;;  %v2002_v53 = vsel %vm1779_vm4, %v1927_v35, 0.0  ;;  %v1596_v44 = vmul.f32 %v3251_v39, %v3251_v39  ;;  %v1471_v20 = vsel %vm121_vm1, %v3268_v43, 0.0 }
  0xf1   :  { %v3377_v50 = vpop.f32.mrf.mxu0  ;;  %v3379_v52 = vpop.f32.mrf.mxu1  ;;  %1397 = vst.msk [vmem:[%s4600_s4 + $0x3c] sm:$0xf] %vm1381_vm3, %v2447_v47  ;;  %v1594_v54 = vmul.f32 %v3268_v43, %v3268_v43  ;;  %v2003_v55 = vadd.f32 %v2002_v53, %v2001_v36  ;;  %v1472_v56 = vadd.f32 %v1471_v20, %v1470_v33  ;;  %v2445_v57 = vpack.c.bf16 %v3270_v51, %v3270_v51 }
  0xf2   :  { %1074 = vst.msk [vmem:[%s4599_s3 + $0x34] sm:$0xf] %vm1060_vm2, %v2381_v19  ;;  %v1805_v58 = vsel %vm1779_vm4, %v3270_v51, 0.0  ;;  %v1928_v2 = vmul.f32 %v3270_v51, %v3270_v51  ;;  %v2386_v3 = vpack.c.bf16 %v3288_v59, %v3288_v59  ;;  %v1672_v4 = vsel %vm121_vm1, %v1595_v42, 0.0 }
  0xf3   :  { %v3400_v61 = vpop.f32.mrf.mxu0  ;;  %v3402_v62 = vpop.f32.mrf.mxu1  ;;  %v1670_v1 = vsel %vm121_vm1, %v1594_v54, 0.0  ;;  %v1806_v43 = vadd.f32 %v1805_v58, %v1804_v46  ;;  %v2006_v5 = vsel %vm1779_vm4, %v1929_v48, 0.0  ;;  %v1474_v6 = vadd.f32 %v1473_v32, %v1472_v56  ;;  %1395 = vst.msk [vmem:[%s4600_s4 + $0x34] sm:$0xf] %vm1381_vm3, %v2445_v57 }
  0xf4   :  { %v1671_v9 = vadd.f32 %v1670_v1, %v1669_v49  ;;  %v1930_v51 = vmul.f32 %v3253_v40, %v3253_v40  ;;  %v2004_v13 = vsel %vm1779_vm4, %v1928_v2, 0.0  ;;  %1079 = vst.msk [vmem:[%s4599_s3 + $0x48] sm:$0xf] %vm1060_vm2, %v2386_v3  ;;  %v2450_v14 = vpack.c.bf16 %v3290_v60, %v3290_v60 }
  0xf5   :  { %v3415_v10 = vpop.f32.mrf.mxu0  ;;  %v3417_v11 = vpop.f32.mrf.mxu1  ;;  %v1808_v12 = vadd.f32 %v1807_v30, %v1806_v43  ;;  %v1475_v15 = vsel %vm121_vm1, %v3251_v39, 0.0  ;;  %v1809_v16 = vsel %vm1779_vm4, %v3253_v40, 0.0  ;;  %v2005_v22 = vadd.f32 %v2004_v13, %v2003_v55 }
  0xf6   :  { %v1673_v21 = vadd.f32 %v1672_v4, %v1671_v9  ;;  %v1674_v25 = vsel %vm121_vm1, %v1596_v44, 0.0  ;;  %1400 = vst.msk [vmem:[%s4600_s4 + $0x48] sm:$0xf] %vm1381_vm3, %v2450_v14  ;;  %v2384_v26 = vpack.c.bf16 %v3303_v7, %v3303_v7  ;;  %v1476_v39 = vadd.f32 %v1475_v15, %v1474_v6 }
  0xf7   :  { %v3432_v63 = vpop.f32.mrf.mxu0  ;;  %v3434_v0 = vpop.f32.mrf.mxu1  ;;  %v1597_v40 = vmul.f32 %v3303_v7, %v3303_v7  ;;  %v2007_v23 = vadd.f32 %v2006_v5, %v2005_v22  ;;  %v1477_v27 = vsel %vm121_vm1, %v3303_v7, 0.0  ;;  %v2448_v32 = vpack.c.bf16 %v3305_v8, %v3305_v8 }
  0xf8   :  { %v1675_v31 = vadd.f32 %v1674_v25, %v1673_v21  ;;  %v2008_v34 = vsel %vm1779_vm4, %v1930_v51, 0.0  ;;  %v1481_v35 = vsel %vm121_vm1, %v3288_v59, 0.0  ;;  %1077 = vst.msk [vmem:[%s4599_s3 + $0x40] sm:$0xf] %vm1060_vm2, %v2384_v26  ;;  %v1478_v36 = vadd.f32 %v1477_v27, %v1476_v39 }
  0xf9   :  { %v3449_v33 = vpop.f32.mrf.mxu0  ;;  %v3451_v29 = vpop.f32.mrf.mxu1  ;;  %v1810_v7 = vadd.f32 %v1809_v16, %v1808_v12  ;;  %1398 = vst.msk [vmem:[%s4600_s4 + $0x40] sm:$0xf] %vm1381_vm3, %v2448_v32  ;;  %v1811_v37 = vsel %vm1779_vm4, %v3305_v8, 0.0  ;;  %v1931_v42 = vmul.f32 %v3305_v8, %v3305_v8  ;;  %v2009_v45 = vadd.f32 %v2008_v34, %v2007_v23 }
  0xfa   :  { %v2387_v46 = vpack.c.bf16 %v3320_v17, %v3320_v17  ;;  %v1599_v48 = vmul.f32 %v3288_v59, %v3288_v59  ;;  %v1676_v49 = vsel %vm121_vm1, %v1597_v40, 0.0  ;;  %v2451_v53 = vpack.c.bf16 %v3322_v18, %v3322_v18 }
  0xfb   :  { %v3470_v47 = vpop.f32.mrf.mxu0  ;;  %v3472_v30 = vpop.f32.mrf.mxu1  ;;  %v1812_v19 = vadd.f32 %v1811_v37, %v1810_v7  ;;  %v1815_v8 = vsel %vm1779_vm4, %v3290_v60, 0.0  ;;  %v1933_v44 = vmul.f32 %v3290_v60, %v3290_v60  ;;  %v1677_v20 = vadd.f32 %v1676_v49, %v1675_v31 }
  0xfc   :  { %1080 = vst.msk [vmem:[%s4599_s3 + $0x4c] sm:$0xf] %vm1060_vm2, %v2387_v46  ;;  %v2385_v59 = vpack.c.bf16 %v3337_v24, %v3337_v24  ;;  %v2010_v56 = vsel %vm1779_vm4, %v1931_v42, 0.0  ;;  %v1600_v57 = vmul.f32 %v3320_v17, %v3320_v17  ;;  %v1479_v60 = vsel %vm121_vm1, %v3337_v24, 0.0 }
  0xfd   :  { %v3489_v54 = vpop.f32.mrf.mxu0  ;;  %v3491_v55 = vpop.f32.mrf.mxu1  ;;  %1401 = vst.msk [vmem:[%s4600_s4 + $0x4c] sm:$0xf] %vm1381_vm3, %v2451_v53  ;;  %v1598_v58 = vmul.f32 %v3337_v24, %v3337_v24  ;;  %v2011_v1 = vadd.f32 %v2010_v56, %v2009_v45  ;;  %v1480_v43 = vadd.f32 %v1479_v60, %v1478_v36  ;;  %v2449_v2 = vpack.c.bf16 %v3339_v28, %v3339_v28 }
  0xfe   :  { %1078 = vst.msk [vmem:[%s4599_s3 + $0x44] sm:$0xf] %vm1060_vm2, %v2385_v59  ;;  %v1813_v3 = vsel %vm1779_vm4, %v3339_v28, 0.0  ;;  %v1932_v9 = vmul.f32 %v3339_v28, %v3339_v28  ;;  %v2390_v51 = vpack.c.bf16 %v3358_v38, %v3358_v38  ;;  %v1680_v12 = vsel %vm121_vm1, %v1599_v48, 0.0 }
  0xff   :  { %v3512_v4 = vpop.f32.mrf.mxu0  ;;  %v3514_v5 = vpop.f32.mrf.mxu1  ;;  %v1678_v6 = vsel %vm121_vm1, %v1598_v58, 0.0  ;;  %v1814_v24 = vadd.f32 %v1813_v3, %v1812_v19  ;;  %v2014_v13 = vsel %vm1779_vm4, %v1933_v44, 0.0  ;;  %v1482_v14 = vadd.f32 %v1481_v35, %v1480_v43  ;;  %1399 = vst.msk [vmem:[%s4600_s4 + $0x44] sm:$0xf] %vm1381_vm3, %v2449_v2 }
 0x100   :  { %v1679_v15 = vadd.f32 %v1678_v6, %v1677_v20  ;;  %v1934_v28 = vmul.f32 %v3322_v18, %v3322_v18  ;;  %v2012_v25 = vsel %vm1779_vm4, %v1932_v9, 0.0  ;;  %1083 = vst.msk [vmem:[%s4599_s3 + $0x58] sm:$0xf] %vm1060_vm2, %v2390_v51  ;;  %v2454_v26 = vpack.c.bf16 %v3360_v41, %v3360_v41 }
 0x101   :  { %v3527_v16 = vpop.f32.mrf.mxu0  ;;  %v3529_v21 = vpop.f32.mrf.mxu1  ;;  %v1816_v22 = vadd.f32 %v1815_v8, %v1814_v24  ;;  %v1483_v39 = vsel %vm121_vm1, %v3320_v17, 0.0  ;;  %v1817_v40 = vsel %vm1779_vm4, %v3322_v18, 0.0  ;;  %v2013_v27 = vadd.f32 %v2012_v25, %v2011_v1 }
 0x102   :  { %v1681_v23 = vadd.f32 %v1680_v12, %v1679_v15  ;;  %v1682_v34 = vsel %vm121_vm1, %v1600_v57, 0.0  ;;  %1404 = vst.msk [vmem:[%s4600_s4 + $0x58] sm:$0xf] %vm1381_vm3, %v2454_v26  ;;  %v2388_v35 = vpack.c.bf16 %v3377_v50, %v3377_v50  ;;  %v1484_v17 = vadd.f32 %v1483_v39, %v1482_v14 }
 0x103   :  { %v3544_v31 = vpop.f32.mrf.mxu0  ;;  %v3546_v32 = vpop.f32.mrf.mxu1  ;;  %v1601_v18 = vmul.f32 %v3377_v50, %v3377_v50  ;;  %v2015_v36 = vadd.f32 %v2014_v13, %v2013_v27  ;;  %v1485_v7 = vsel %vm121_vm1, %v3377_v50, 0.0  ;;  %v2452_v42 = vpack.c.bf16 %v3379_v52, %v3379_v52 }
 0x104   :  { %v1683_v37 = vadd.f32 %v1682_v34, %v1681_v23  ;;  %v2016_v48 = vsel %vm1779_vm4, %v1934_v28, 0.0  ;;  %v1489_v49 = vsel %vm121_vm1, %v3358_v38, 0.0  ;;  %1081 = vst.msk [vmem:[%s4599_s3 + $0x50] sm:$0xf] %vm1060_vm2, %v2388_v35  ;;  %v1486_v19 = vadd.f32 %v1485_v7, %v1484_v17 }
 0x105   :  { %v3561_v45 = vpop.f32.mrf.mxu0  ;;  %v3563_v46 = vpop.f32.mrf.mxu1  ;;  %v1818_v50 = vadd.f32 %v1817_v40, %v1816_v22  ;;  %1402 = vst.msk [vmem:[%s4600_s4 + $0x50] sm:$0xf] %vm1381_vm3, %v2452_v42  ;;  %v1819_v53 = vsel %vm1779_vm4, %v3379_v52, 0.0  ;;  %v1935_v8 = vmul.f32 %v3379_v52, %v3379_v52  ;;  %v2017_v44 = vadd.f32 %v2016_v48, %v2015_v36 }
 0x106   :  { %v2391_v20 = vpack.c.bf16 %v3400_v61, %v3400_v61  ;;  %v1603_v57 = vmul.f32 %v3358_v38, %v3358_v38  ;;  %v1684_v60 = vsel %vm121_vm1, %v1601_v18, 0.0  ;;  %v2455_v1 = vpack.c.bf16 %v3402_v62, %v3402_v62 }
 0x107   :  { %v3582_v59 = vpop.f32.mrf.mxu0  ;;  %v3584_v56 = vpop.f32.mrf.mxu1  ;;  %v1820_v58 = vadd.f32 %v1819_v53, %v1818_v50  ;;  %v1823_v52 = vsel %vm1779_vm4, %v3360_v41, 0.0  ;;  %v1937_v43 = vmul.f32 %v3360_v41, %v3360_v41  ;;  %v1685_v2 = vadd.f32 %v1684_v60, %v1683_v37 }
 0x108   :  { %1084 = vst.msk [vmem:[%s4599_s3 + $0x5c] sm:$0xf] %vm1060_vm2, %v2391_v20  ;;  %v2389_v38 = vpack.c.bf16 %v3415_v10, %v3415_v10  ;;  %v2018_v24 = vsel %vm1779_vm4, %v1935_v8, 0.0  ;;  %v1604_v9 = vmul.f32 %v3400_v61, %v3400_v61  ;;  %v1487_v41 = vsel %vm121_vm1, %v3415_v10, 0.0 }
 0x109   :  { %v3601_v3 = vpop.f32.mrf.mxu0  ;;  %v3603_v6 = vpop.f32.mrf.mxu1  ;;  %1405 = vst.msk [vmem:[%s4600_s4 + $0x5c] sm:$0xf] %vm1381_vm3, %v2455_v1  ;;  %v1602_v51 = vmul.f32 %v3415_v10, %v3415_v10  ;;  %v2019_v12 = vadd.f32 %v2018_v24, %v2017_v44  ;;  %v1488_v13 = vadd.f32 %v1487_v41, %v1486_v19  ;;  %v2453_v14 = vpack.c.bf16 %v3417_v11, %v3417_v11 }
 0x10a   :  { %1082 = vst.msk [vmem:[%s4599_s3 + $0x54] sm:$0xf] %vm1060_vm2, %v2389_v38  ;;  %v1821_v15 = vsel %vm1779_vm4, %v3417_v11, 0.0  ;;  %v1936_v10 = vmul.f32 %v3417_v11, %v3417_v11  ;;  %v2394_v26 = vpack.c.bf16 %v3432_v63, %v3432_v63  ;;  %v1688_v40 = vsel %vm121_vm1, %v1603_v57, 0.0 }
 0x10b   :  { %v3624_v28 = vpop.f32.mrf.mxu0  ;;  %v1686_v22 = vsel %vm121_vm1, %v1602_v51, 0.0  ;;  %v1822_v25 = vadd.f32 %v1821_v15, %v1820_v58  ;;  %v3631_v39 = vpop.f32.mrf.mxu1  ;;  %v2022_v23 = vsel %vm1779_vm4, %v1937_v43, 0.0  ;;  %v1490_v27 = vadd.f32 %v1489_v49, %v1488_v13  ;;  %1403 = vst.msk [vmem:[%s4600_s4 + $0x54] sm:$0xf] %vm1381_vm3, %v2453_v14 }
 0x10c   :  { %v1687_v34 = vadd.f32 %v1686_v22, %v1685_v2  ;;  %v1938_v35 = vmul.f32 %v3402_v62, %v3402_v62  ;;  %v2020_v17 = vsel %vm1779_vm4, %v1936_v10, 0.0  ;;  %1087 = vst.msk [vmem:[%s4599_s3 + $0x68] sm:$0xf] %vm1060_vm2, %v2394_v26  ;;  %v2458_v18 = vpack.c.bf16 %v3434_v0, %v3434_v0 }
 0x10d   :  { %v1824_v11 = vadd.f32 %v1823_v52, %v1822_v25  ;;  %v3648_v36 = vpop.f32.mrf.mxu0  ;;  %v1491_v7 = vsel %vm121_vm1, %v3400_v61, 0.0  ;;  %v1825_v37 = vsel %vm1779_vm4, %v3402_v62, 0.0  ;;  %v2021_v48 = vadd.f32 %v2020_v17, %v2019_v12  ;;  %v3663_v61 = vpop.f32.mrf.mxu1 }
 0x10e   :  { %v1689_v42 = vadd.f32 %v1688_v40, %v1687_v34  ;;  %v1690_v49 = vsel %vm121_vm1, %v1604_v9, 0.0  ;;  %1408 = vst.msk [vmem:[%s4600_s4 + $0x68] sm:$0xf] %vm1381_vm3, %v2458_v18  ;;  %v2392_v19 = vpack.c.bf16 %v3449_v33, %v3449_v33  ;;  %v1492_v50 = vadd.f32 %v1491_v7, %v1490_v27 }
 0x10f   :  { %v1605_v53 = vmul.f32 %v3449_v33, %v3449_v33  ;;  %v2023_v8 = vadd.f32 %v2022_v23, %v2021_v48  ;;  %v1493_v62 = vsel %vm121_vm1, %v3449_v33, 0.0  ;;  %v2456_v20 = vpack.c.bf16 %v3451_v29, %v3451_v29  ;;  %v3676_v52 = vpop.f32.mrf.mxu0  ;;  %v3693_v12 = vpop.f32.mrf.mxu1 }
 0x110   :  { %v1691_v44 = vadd.f32 %v1690_v49, %v1689_v42  ;;  %v2024_v57 = vsel %vm1779_vm4, %v1938_v35, 0.0  ;;  %v1497_v60 = vsel %vm121_vm1, %v3432_v63, 0.0  ;;  %1085 = vst.msk [vmem:[%s4599_s3 + $0x60] sm:$0xf] %vm1060_vm2, %v2392_v19  ;;  %v1494_v58 = vadd.f32 %v1493_v62, %v1492_v50 }
 0x111   :  { %v1826_v1 = vadd.f32 %v1825_v37, %v1824_v11  ;;  %1406 = vst.msk [vmem:[%s4600_s4 + $0x60] sm:$0xf] %vm1381_vm3, %v2456_v20  ;;  %v1827_v33 = vsel %vm1779_vm4, %v3451_v29, 0.0  ;;  %v1939_v43 = vmul.f32 %v3451_v29, %v3451_v29  ;;  %v2025_v2 = vadd.f32 %v2024_v57, %v2023_v8  ;;  %v3716_v10 = vpop.f32.mrf.mxu0  ;;  %v3731_v17 = vpop.f32.mrf.mxu1 }
 0x112   :  { %v2395_v38 = vpack.c.bf16 %v3470_v47, %v3470_v47  ;;  %v1607_v24 = vmul.f32 %v3432_v63, %v3432_v63  ;;  %v1692_v9 = vsel %vm121_vm1, %v1605_v53, 0.0  ;;  %v2459_v51 = vpack.c.bf16 %v3472_v30, %v3472_v30 }
 0x113   :  { %v1828_v41 = vadd.f32 %v1827_v33, %v1826_v1  ;;  %v1831_v13 = vsel %vm1779_vm4, %v3434_v0, 0.0  ;;  %v1941_v29 = vmul.f32 %v3434_v0, %v3434_v0  ;;  %v1693_v14 = vadd.f32 %v1692_v9, %v1691_v44  ;;  %v3748_v50 = vpop.f32.mrf.mxu0 }
 0x114   :  { %1088 = vst.msk [vmem:[%s4599_s3 + $0x6c] sm:$0xf] %vm1060_vm2, %v2395_v38  ;;  %v2393_v63 = vpack.c.bf16 %v3489_v54, %v3489_v54  ;;  %v2026_v15 = vsel %vm1779_vm4, %v1939_v43, 0.0  ;;  %v1608_v22 = vmul.f32 %v3470_v47, %v3470_v47  ;;  %v1495_v0 = vsel %vm121_vm1, %v3489_v54, 0.0 }
 0x115   :  { %1409 = vst.msk [vmem:[%s4600_s4 + $0x6c] sm:$0xf] %vm1381_vm3, %v2459_v51  ;;  %v1606_v25 = vmul.f32 %v3489_v54, %v3489_v54  ;;  %v2027_v26 = vadd.f32 %v2026_v15, %v2025_v2  ;;  %v1496_v40 = vadd.f32 %v1495_v0, %v1494_v58  ;;  %v2457_v23 = vpack.c.bf16 %v3491_v55, %v3491_v55 }
 0x116   :  { %1086 = vst.msk [vmem:[%s4599_s3 + $0x64] sm:$0xf] %vm1060_vm2, %v2393_v63  ;;  %v1829_v27 = vsel %vm1779_vm4, %v3491_v55, 0.0  ;;  %v1940_v54 = vmul.f32 %v3491_v55, %v3491_v55  ;;  %v2398_v11 = vpack.c.bf16 %v3512_v4, %v3512_v4  ;;  %v1696_v18 = vsel %vm121_vm1, %v1607_v24, 0.0 }
 0x117   :  { %v1694_v34 = vsel %vm121_vm1, %v1606_v25, 0.0  ;;  %v1830_v35 = vadd.f32 %v1829_v27, %v1828_v41  ;;  %v2030_v7 = vsel %vm1779_vm4, %v1941_v29, 0.0  ;;  %v1498_v37 = vadd.f32 %v1497_v60, %v1496_v40  ;;  %1407 = vst.msk [vmem:[%s4600_s4 + $0x64] sm:$0xf] %vm1381_vm3, %v2457_v23  ;;  %v3776_v41 = vpop.f32.mrf.mxu0 }
 0x118   :  { %v1695_v42 = vadd.f32 %v1694_v34, %v1693_v14  ;;  %v1942_v48 = vmul.f32 %v3472_v30, %v3472_v30  ;;  %v2028_v49 = vsel %vm1779_vm4, %v1940_v54, 0.0  ;;  %1091 = vst.msk [vmem:[%s4599_s3 + $0x78] sm:$0xf] %vm1060_vm2, %v2398_v11  ;;  %v2462_v19 = vpack.c.bf16 %v3514_v5, %v3514_v5 }
 0x119   :  { %v1832_v55 = vadd.f32 %v1831_v13, %v1830_v35  ;;  %v1499_v53 = vsel %vm121_vm1, %v3470_v47, 0.0  ;;  %v1833_v8 = vsel %vm1779_vm4, %v3472_v30, 0.0  ;;  %v2029_v44 = vadd.f32 %v2028_v49, %v2027_v26  ;;  %v3763_v47 = vpop.f32.mrf.mxu1  ;;  %v3816_v34 = vpop.f32.mrf.mxu0 }
 0x11a   :  { %v1697_v62 = vadd.f32 %v1696_v18, %v1695_v42  ;;  %v1698_v20 = vsel %vm121_vm1, %v1608_v22, 0.0  ;;  %1412 = vst.msk [vmem:[%s4600_s4 + $0x78] sm:$0xf] %vm1381_vm3, %v2462_v19  ;;  %v2396_v57 = vpack.c.bf16 %v3527_v16, %v3527_v16  ;;  %v1500_v60 = vadd.f32 %v1499_v53, %v1498_v37 }
 0x11b   :  { %v1609_v58 = vmul.f32 %v3527_v16, %v3527_v16  ;;  %v2031_v1 = vadd.f32 %v2030_v7, %v2029_v44  ;;  %v1501_v30 = vsel %vm121_vm1, %v3527_v16, 0.0  ;;  %v2460_v43 = vpack.c.bf16 %v3529_v21, %v3529_v21  ;;  %v3793_v0 = vpop.f32.mrf.mxu1 }
 0x11c   :  { %v1699_v33 = vadd.f32 %v1698_v20, %v1697_v62  ;;  %v2032_v2 = vsel %vm1779_vm4, %v1942_v48, 0.0  ;;  %v1505_v38 = vsel %vm121_vm1, %v3512_v4, 0.0  ;;  %1089 = vst.msk [vmem:[%s4599_s3 + $0x70] sm:$0xf] %vm1060_vm2, %v2396_v57  ;;  %v1502_v24 = vadd.f32 %v1501_v30, %v1500_v60  ;;  %v3848_v20 = vpop.f32.mrf.mxu0 }
 0x11d   :  { %v1834_v9 = vadd.f32 %v1833_v8, %v1832_v55  ;;  %1410 = vst.msk [vmem:[%s4600_s4 + $0x70] sm:$0xf] %vm1381_vm3, %v2460_v43  ;;  %v1835_v16 = vsel %vm1779_vm4, %v3529_v21, 0.0  ;;  %v1943_v51 = vmul.f32 %v3529_v21, %v3529_v21  ;;  %v2033_v13 = vadd.f32 %v2032_v2, %v2031_v1  ;;  %v3831_v48 = vpop.f32.mrf.mxu1 }
 0x11e   :  { %v2399_v29 = vpack.c.bf16 %v3544_v31, %v3544_v31  ;;  %v1611_v14 = vmul.f32 %v3512_v4, %v3512_v4  ;;  %v1700_v63 = vsel %vm121_vm1, %v1609_v58, 0.0  ;;  %v2463_v22 = vpack.c.bf16 %v3546_v32, %v3546_v32 }
 0x11f   :  { %v1836_v15 = vadd.f32 %v1835_v16, %v1834_v9  ;;  %v1839_v25 = vsel %vm1779_vm4, %v3514_v5, 0.0  ;;  %v1945_v21 = vmul.f32 %v3514_v5, %v3514_v5  ;;  %v1701_v26 = vadd.f32 %v1700_v63, %v1699_v33 }
 0x120   :  { %1092 = vst.msk [vmem:[%s4599_s3 + $0x7c] sm:$0xf] %vm1060_vm2, %v2399_v29  ;;  %v2397_v4 = vpack.c.bf16 %v3561_v45, %v3561_v45  ;;  %v2034_v40 = vsel %vm1779_vm4, %v1943_v51, 0.0  ;;  %v1612_v23 = vmul.f32 %v3544_v31, %v3544_v31  ;;  %v1503_v5 = vsel %vm121_vm1, %v3561_v45, 0.0 }
 0x121   :  { %1413 = vst.msk [vmem:[%s4600_s4 + $0x7c] sm:$0xf] %vm1381_vm3, %v2463_v22  ;;  %v1610_v27 = vmul.f32 %v3561_v45, %v3561_v45  ;;  %v2035_v35 = vadd.f32 %v2034_v40, %v2033_v13  ;;  %v1504_v54 = vadd.f32 %v1503_v5, %v1502_v24  ;;  %v2461_v11 = vpack.c.bf16 %v3563_v46, %v3563_v46 }
 0x122   :  { %1090 = vst.msk [vmem:[%s4599_s3 + $0x74] sm:$0xf] %vm1060_vm2, %v2397_v4  ;;  %v1837_v18 = vsel %vm1779_vm4, %v3563_v46, 0.0  ;;  %v1944_v45 = vmul.f32 %v3563_v46, %v3563_v46  ;;  %v2402_v42 = vpack.c.bf16 %v3582_v59, %v3582_v59  ;;  %v1704_v55 = vsel %vm121_vm1, %v1611_v14, 0.0  ;;  %v3876_v14 = vpop.f32.mrf.mxu0 }
 0x123   :  { %v1702_v7 = vsel %vm121_vm1, %v1610_v27, 0.0  ;;  %v1838_v37 = vadd.f32 %v1837_v18, %v1836_v15  ;;  %v2038_v49 = vsel %vm1779_vm4, %v1945_v21, 0.0  ;;  %v1506_v19 = vadd.f32 %v1505_v38, %v1504_v54  ;;  %1411 = vst.msk [vmem:[%s4600_s4 + $0x74] sm:$0xf] %vm1381_vm3, %v2461_v11 }
 0x124   :  { %v1703_v53 = vadd.f32 %v1702_v7, %v1701_v26  ;;  %v1946_v8 = vmul.f32 %v3546_v32, %v3546_v32  ;;  %v2036_v62 = vsel %vm1779_vm4, %v1944_v45, 0.0  ;;  %1095 = vst.msk [vmem:[%s4599_s3 + $0x88] sm:$0xf] %vm1060_vm2, %v2402_v42  ;;  %v2466_v44 = vpack.c.bf16 %v3584_v56, %v3584_v56  ;;  %v3916_v11 = vpop.f32.mrf.mxu0 }
 0x125   :  { %v1840_v46 = vadd.f32 %v1839_v25, %v1838_v37  ;;  %v1507_v57 = vsel %vm121_vm1, %v3544_v31, 0.0  ;;  %v1841_v60 = vsel %vm1779_vm4, %v3546_v32, 0.0  ;;  %v2037_v1 = vadd.f32 %v2036_v62, %v2035_v35  ;;  %v3863_v31 = vpop.f32.mrf.mxu1 }
 0x126   :  { %v1705_v58 = vadd.f32 %v1704_v55, %v1703_v53  ;;  %v1706_v30 = vsel %vm121_vm1, %v1612_v23, 0.0  ;;  %1416 = vst.msk [vmem:[%s4600_s4 + $0x88] sm:$0xf] %vm1381_vm3, %v2466_v44  ;;  %v2400_v33 = vpack.c.bf16 %v3601_v3, %v3601_v3  ;;  %v1508_v43 = vadd.f32 %v1507_v57, %v1506_v19 }
 0x127   :  { %v1613_v2 = vmul.f32 %v3601_v3, %v3601_v3  ;;  %v2039_v38 = vadd.f32 %v2038_v49, %v2037_v1  ;;  %v1509_v32 = vsel %vm121_vm1, %v3601_v3, 0.0  ;;  %v2464_v9 = vpack.c.bf16 %v3603_v6, %v3603_v6  ;;  %v3893_v40 = vpop.f32.mrf.mxu1 }
 0x128   :  { %v1707_v24 = vadd.f32 %v1706_v30, %v1705_v58  ;;  %v2040_v16 = vsel %vm1779_vm4, %v1946_v8, 0.0  ;;  %v1513_v51 = vsel %vm121_vm1, %v3582_v59, 0.0  ;;  %1093 = vst.msk [vmem:[%s4599_s3 + $0x80] sm:$0xf] %vm1060_vm2, %v2400_v33  ;;  %v1510_v13 = vadd.f32 %v1509_v32, %v1508_v43  ;;  %v3948_v58 = vpop.f32.mrf.mxu0 }
 0x129   :  { %v1842_v29 = vadd.f32 %v1841_v60, %v1840_v46  ;;  %1414 = vst.msk [vmem:[%s4600_s4 + $0x80] sm:$0xf] %vm1381_vm3, %v2464_v9  ;;  %v1843_v3 = vsel %vm1779_vm4, %v3603_v6, 0.0  ;;  %v1947_v63 = vmul.f32 %v3603_v6, %v3603_v6  ;;  %v2041_v15 = vadd.f32 %v2040_v16, %v2039_v38  ;;  %v3931_v19 = vpop.f32.mrf.mxu1 }
 0x12a   :  { %v2403_v22 = vpack.c.bf16 %v3624_v28, %v3624_v28  ;;  %v1615_v25 = vmul.f32 %v3582_v59, %v3582_v59  ;;  %v1708_v21 = vsel %vm121_vm1, %v1613_v2, 0.0  ;;  %v2467_v4 = vpack.c.bf16 %v3631_v39, %v3631_v39 }
 0x12b   :  { %v1844_v26 = vadd.f32 %v1843_v3, %v1842_v29  ;;  %v1847_v23 = vsel %vm1779_vm4, %v3584_v56, 0.0  ;;  %v1949_v6 = vmul.f32 %v3584_v56, %v3584_v56  ;;  %v1709_v5 = vadd.f32 %v1708_v21, %v1707_v24 }
 0x12c   :  { %1096 = vst.msk [vmem:[%s4599_s3 + $0x8c] sm:$0xf] %vm1060_vm2, %v2403_v22  ;;  %v2401_v59 = vpack.c.bf16 %v3648_v36, %v3648_v36  ;;  %v2042_v27 = vsel %vm1779_vm4, %v1947_v63, 0.0  ;;  %v1616_v35 = vmul.f32 %v3624_v28, %v3624_v28  ;;  %v1511_v56 = vsel %vm121_vm1, %v3648_v36, 0.0 }
 0x12d   :  { %1417 = vst.msk [vmem:[%s4600_s4 + $0x8c] sm:$0xf] %vm1381_vm3, %v2467_v4  ;;  %v1614_v54 = vmul.f32 %v3648_v36, %v3648_v36  ;;  %v2043_v18 = vadd.f32 %v2042_v27, %v2041_v15  ;;  %v1512_v7 = vadd.f32 %v1511_v56, %v1510_v13  ;;  %v2465_v37 = vpack.c.bf16 %v3663_v61, %v3663_v61  ;;  %v3976_v15 = vpop.f32.mrf.mxu0 }
 0x12e   :  { %1094 = vst.msk [vmem:[%s4599_s3 + $0x84] sm:$0xf] %vm1060_vm2, %v2401_v59  ;;  %v1845_v45 = vsel %vm1779_vm4, %v3663_v61, 0.0  ;;  %v1948_v36 = vmul.f32 %v3663_v61, %v3663_v61  ;;  %v2406_v49 = vpack.c.bf16 %v3676_v52, %v3676_v52  ;;  %v1712_v53 = vsel %vm121_vm1, %v1615_v25, 0.0 }
 0x12f   :  { %v1710_v42 = vsel %vm121_vm1, %v1614_v54, 0.0  ;;  %v1846_v55 = vadd.f32 %v1845_v45, %v1844_v26  ;;  %v2046_v8 = vsel %vm1779_vm4, %v1949_v6, 0.0  ;;  %v1514_v46 = vadd.f32 %v1513_v51, %v1512_v7  ;;  %1415 = vst.msk [vmem:[%s4600_s4 + $0x84] sm:$0xf] %vm1381_vm3, %v2465_v37 }
 0x130   :  { %v1711_v62 = vadd.f32 %v1710_v42, %v1709_v5  ;;  %v1950_v44 = vmul.f32 %v3631_v39, %v3631_v39  ;;  %v2044_v57 = vsel %vm1779_vm4, %v1948_v36, 0.0  ;;  %1099 = vst.msk [vmem:[%s4599_s3 + $0x98] sm:$0xf] %vm1060_vm2, %v2406_v49  ;;  %v2470_v60 = vpack.c.bf16 %v3693_v12, %v3693_v12 }
 0x131   :  { %v1848_v61 = vadd.f32 %v1847_v23, %v1846_v55  ;;  %v1515_v1 = vsel %vm121_vm1, %v3624_v28, 0.0  ;;  %v1849_v30 = vsel %vm1779_vm4, %v3631_v39, 0.0  ;;  %v2045_v43 = vadd.f32 %v2044_v57, %v2043_v18  ;;  %v3963_v28 = vpop.f32.mrf.mxu1  ;;  %v4016_v18 = vpop.f32.mrf.mxu0 }
 0x132   :  { %v1713_v33 = vadd.f32 %v1712_v53, %v1711_v62  ;;  %v1714_v2 = vsel %vm121_vm1, %v1616_v35, 0.0  ;;  %1420 = vst.msk [vmem:[%s4600_s4 + $0x98] sm:$0xf] %vm1381_vm3, %v2470_v60  ;;  %v2404_v38 = vpack.c.bf16 %v3716_v10, %v3716_v10  ;;  %v1516_v32 = vadd.f32 %v1515_v1, %v1514_v46 }
 0x133   :  { %v1617_v24 = vmul.f32 %v3716_v10, %v3716_v10  ;;  %v2047_v9 = vadd.f32 %v2046_v8, %v2045_v43  ;;  %v1517_v39 = vsel %vm121_vm1, %v3716_v10, 0.0  ;;  %v2468_v51 = vpack.c.bf16 %v3731_v17, %v3731_v17  ;;  %v3993_v5 = vpop.f32.mrf.mxu1  ;;  %v4048_v1 = vpop.f32.mrf.mxu0 }
 0x134   :  { %v1715_v16 = vadd.f32 %v1714_v2, %v1713_v33  ;;  %v2048_v13 = vsel %vm1779_vm4, %v1950_v44, 0.0  ;;  %v1521_v29 = vsel %vm121_vm1, %v3676_v52, 0.0  ;;  %1097 = vst.msk [vmem:[%s4599_s3 + $0x90] sm:$0xf] %vm1060_vm2, %v2404_v38  ;;  %v1518_v3 = vadd.f32 %v1517_v39, %v1516_v32 }
 0x135   :  { %v1850_v63 = vadd.f32 %v1849_v30, %v1848_v61  ;;  %1418 = vst.msk [vmem:[%s4600_s4 + $0x90] sm:$0xf] %vm1381_vm3, %v2468_v51  ;;  %v1851_v10 = vsel %vm1779_vm4, %v3731_v17, 0.0  ;;  %v1951_v22 = vmul.f32 %v3731_v17, %v3731_v17  ;;  %v2049_v25 = vadd.f32 %v2048_v13, %v2047_v9  ;;  %v4031_v53 = vpop.f32.mrf.mxu1 }
 0x136   :  { %v2407_v21 = vpack.c.bf16 %v3748_v50, %v3748_v50  ;;  %v1619_v26 = vmul.f32 %v3676_v52, %v3676_v52  ;;  %v1716_v4 = vsel %vm121_vm1, %v1617_v24, 0.0  ;;  %v2471_v6 = vpack.c.bf16 %v3763_v47, %v3763_v47 }
 0x137   :  { %v1852_v23 = vadd.f32 %v1851_v10, %v1850_v63  ;;  %v1855_v59 = vsel %vm1779_vm4, %v3693_v12, 0.0  ;;  %v1953_v17 = vmul.f32 %v3693_v12, %v3693_v12  ;;  %v1717_v27 = vadd.f32 %v1716_v4, %v1715_v16  ;;  %v4076_v10 = vpop.f32.mrf.mxu0 }
 0x138   :  { %1100 = vst.msk [vmem:[%s4599_s3 + $0x9c] sm:$0xf] %vm1060_vm2, %v2407_v21  ;;  %v2405_v52 = vpack.c.bf16 %v3776_v41, %v3776_v41  ;;  %v2050_v35 = vsel %vm1779_vm4, %v1951_v22, 0.0  ;;  %v1620_v56 = vmul.f32 %v3748_v50, %v3748_v50  ;;  %v1519_v12 = vsel %vm121_vm1, %v3776_v41, 0.0 }
 0x139   :  { %1421 = vst.msk [vmem:[%s4600_s4 + $0x9c] sm:$0xf] %vm1381_vm3, %v2471_v6  ;;  %v1618_v54 = vmul.f32 %v3776_v41, %v3776_v41  ;;  %v2051_v7 = vadd.f32 %v2050_v35, %v2049_v25  ;;  %v1520_v37 = vadd.f32 %v1519_v12, %v1518_v3  ;;  %v2469_v45 = vpack.c.bf16 %v3793_v0, %v3793_v0  ;;  %v4116_v12 = vpop.f32.mrf.mxu0 }
 0x13a   :  { %1098 = vst.msk [vmem:[%s4599_s3 + $0x94] sm:$0xf] %vm1060_vm2, %v2405_v52  ;;  %v1853_v42 = vsel %vm1779_vm4, %v3793_v0, 0.0  ;;  %v1952_v41 = vmul.f32 %v3793_v0, %v3793_v0  ;;  %v2410_v49 = vpack.c.bf16 %v3816_v34, %v3816_v34  ;;  %v1720_v8 = vsel %vm121_vm1, %v1619_v26, 0.0 }
 0x13b   :  { %v1718_v55 = vsel %vm121_vm1, %v1618_v54, 0.0  ;;  %v1854_v36 = vadd.f32 %v1853_v42, %v1852_v23  ;;  %v2054_v46 = vsel %vm1779_vm4, %v1953_v17, 0.0  ;;  %v1522_v62 = vadd.f32 %v1521_v29, %v1520_v37  ;;  %1419 = vst.msk [vmem:[%s4600_s4 + $0x94] sm:$0xf] %vm1381_vm3, %v2469_v45 }
 0x13c   :  { %v1719_v44 = vadd.f32 %v1718_v55, %v1717_v27  ;;  %v1954_v61 = vmul.f32 %v3763_v47, %v3763_v47  ;;  %v2052_v57 = vsel %vm1779_vm4, %v1952_v41, 0.0  ;;  %1103 = vst.msk [vmem:[%s4599_s3 + $0xa8] sm:$0xf] %vm1060_vm2, %v2410_v49  ;;  %v2474_v60 = vpack.c.bf16 %v3831_v48, %v3831_v48 }
 0x13d   :  { %v1856_v0 = vadd.f32 %v1855_v59, %v1854_v36  ;;  %v1523_v30 = vsel %vm121_vm1, %v3748_v50, 0.0  ;;  %v1857_v33 = vsel %vm1779_vm4, %v3763_v47, 0.0  ;;  %v2053_v2 = vadd.f32 %v2052_v57, %v2051_v7  ;;  %v4063_v50 = vpop.f32.mrf.mxu1  ;;  %v4148_v57 = vpop.f32.mrf.mxu0 }
 0x13e   :  { %v1721_v43 = vadd.f32 %v1720_v8, %v1719_v44  ;;  %v1722_v38 = vsel %vm121_vm1, %v1620_v56, 0.0  ;;  %1424 = vst.msk [vmem:[%s4600_s4 + $0xa8] sm:$0xf] %vm1381_vm3, %v2474_v60  ;;  %v2408_v32 = vpack.c.bf16 %v3848_v20, %v3848_v20  ;;  %v1524_v24 = vadd.f32 %v1523_v30, %v1522_v62 }
 0x13f   :  { %v1621_v9 = vmul.f32 %v3848_v20, %v3848_v20  ;;  %v2055_v39 = vadd.f32 %v2054_v46, %v2053_v2  ;;  %v1525_v47 = vsel %vm121_vm1, %v3848_v20, 0.0  ;;  %v2472_v51 = vpack.c.bf16 %v3863_v31, %v3863_v31  ;;  %v4093_v59 = vpop.f32.mrf.mxu1 }
 0x140   :  { %v1723_v16 = vadd.f32 %v1722_v38, %v1721_v43  ;;  %v2056_v13 = vsel %vm1779_vm4, %v1954_v61, 0.0  ;;  %v1529_v29 = vsel %vm121_vm1, %v3816_v34, 0.0  ;;  %1101 = vst.msk [vmem:[%s4599_s3 + $0xa0] sm:$0xf] %vm1060_vm2, %v2408_v32  ;;  %v1526_v3 = vadd.f32 %v1525_v47, %v1524_v24 }
 0x141   :  { %v1858_v63 = vadd.f32 %v1857_v33, %v1856_v0  ;;  %1422 = vst.msk [vmem:[%s4600_s4 + $0xa0] sm:$0xf] %vm1381_vm3, %v2472_v51  ;;  %v1859_v20 = vsel %vm1779_vm4, %v3863_v31, 0.0  ;;  %v1955_v22 = vmul.f32 %v3863_v31, %v3863_v31  ;;  %v2057_v25 = vadd.f32 %v2056_v13, %v2055_v39  ;;  %v4131_v41 = vpop.f32.mrf.mxu1 }
 0x142   :  { %v2411_v21 = vpack.c.bf16 %v3876_v14, %v3876_v14  ;;  %v1623_v26 = vmul.f32 %v3816_v34, %v3816_v34  ;;  %v1724_v4 = vsel %vm121_vm1, %v1621_v9, 0.0  ;;  %v2475_v6 = vpack.c.bf16 %v3893_v40, %v3893_v40 }
 0x143   :  { %v1860_v23 = vadd.f32 %v1859_v20, %v1858_v63  ;;  %v1863_v17 = vsel %vm1779_vm4, %v3831_v48, 0.0  ;;  %v1957_v31 = vmul.f32 %v3831_v48, %v3831_v48  ;;  %v1725_v27 = vadd.f32 %v1724_v4, %v1723_v16 }
 0x144   :  { %1104 = vst.msk [vmem:[%s4599_s3 + $0xac] sm:$0xf] %vm1060_vm2, %v2411_v21  ;;  %v2409_v34 = vpack.c.bf16 %v3916_v11, %v3916_v11  ;;  %v2058_v52 = vsel %vm1779_vm4, %v1955_v22, 0.0  ;;  %v1624_v35 = vmul.f32 %v3876_v14, %v3876_v14  ;;  %v1527_v48 = vsel %vm121_vm1, %v3916_v11, 0.0 }
 0x145   :  { %1425 = vst.msk [vmem:[%s4600_s4 + $0xac] sm:$0xf] %vm1381_vm3, %v2475_v6  ;;  %v1622_v56 = vmul.f32 %v3916_v11, %v3916_v11  ;;  %v2059_v54 = vadd.f32 %v2058_v52, %v2057_v25  ;;  %v1528_v7 = vadd.f32 %v1527_v48, %v1526_v3  ;;  %v2473_v37 = vpack.c.bf16 %v3931_v19, %v3931_v19  ;;  %v4176_v3 = vpop.f32.mrf.mxu0 }
 0x146   :  { %1102 = vst.msk [vmem:[%s4599_s3 + $0xa4] sm:$0xf] %vm1060_vm2, %v2409_v34  ;;  %v1861_v45 = vsel %vm1779_vm4, %v3931_v19, 0.0  ;;  %v1956_v11 = vmul.f32 %v3931_v19, %v3931_v19  ;;  %v2414_v36 = vpack.c.bf16 %v3948_v58, %v3948_v58  ;;  %v1728_v49 = vsel %vm121_vm1, %v1623_v26, 0.0 }
 0x147   :  { %v1726_v42 = vsel %vm121_vm1, %v1622_v56, 0.0  ;;  %v1862_v55 = vadd.f32 %v1861_v45, %v1860_v23  ;;  %v2062_v8 = vsel %vm1779_vm4, %v1957_v31, 0.0  ;;  %v1530_v46 = vadd.f32 %v1529_v29, %v1528_v7  ;;  %1423 = vst.msk [vmem:[%s4600_s4 + $0xa4] sm:$0xf] %vm1381_vm3, %v2473_v37  ;;  %v4216_v52 = vpop.f32.mrf.mxu0 }
 0x148   :  { %v1727_v62 = vadd.f32 %v1726_v42, %v1725_v27  ;;  %v1958_v44 = vmul.f32 %v3893_v40, %v3893_v40  ;;  %v2060_v61 = vsel %vm1779_vm4, %v1956_v11, 0.0  ;;  %1107 = vst.msk [vmem:[%s4599_s3 + $0xb8] sm:$0xf] %vm1060_vm2, %v2414_v36  ;;  %v2478_v0 = vpack.c.bf16 %v3963_v28, %v3963_v28 }
 0x149   :  { %v1864_v19 = vadd.f32 %v1863_v17, %v1862_v55  ;;  %v1531_v60 = vsel %vm121_vm1, %v3876_v14, 0.0  ;;  %v1865_v30 = vsel %vm1779_vm4, %v3893_v40, 0.0  ;;  %v2061_v43 = vadd.f32 %v2060_v61, %v2059_v54  ;;  %v4163_v14 = vpop.f32.mrf.mxu1 }
 0x14a   :  { %v1729_v33 = vadd.f32 %v1728_v49, %v1727_v62  ;;  %v1730_v2 = vsel %vm121_vm1, %v1624_v35, 0.0  ;;  %1428 = vst.msk [vmem:[%s4600_s4 + $0xb8] sm:$0xf] %vm1381_vm3, %v2478_v0  ;;  %v2412_v38 = vpack.c.bf16 %v3976_v15, %v3976_v15  ;;  %v1532_v32 = vadd.f32 %v1531_v60, %v1530_v46 }
 0x14b   :  { %v1625_v24 = vmul.f32 %v3976_v15, %v3976_v15  ;;  %v2063_v9 = vadd.f32 %v2062_v8, %v2061_v43  ;;  %v1533_v40 = vsel %vm121_vm1, %v3976_v15, 0.0  ;;  %v2476_v47 = vpack.c.bf16 %v3993_v5, %v3993_v5  ;;  %v4193_v23 = vpop.f32.mrf.mxu1 }
 0x14c   :  { %v1731_v39 = vadd.f32 %v1730_v2, %v1729_v33  ;;  %v2064_v16 = vsel %vm1779_vm4, %v1958_v44, 0.0  ;;  %v1537_v51 = vsel %vm121_vm1, %v3948_v58, 0.0  ;;  %1105 = vst.msk [vmem:[%s4599_s3 + $0xb0] sm:$0xf] %vm1060_vm2, %v2412_v38  ;;  %v1534_v13 = vadd.f32 %v1533_v40, %v1532_v32  ;;  %v4248_v44 = vpop.f32.mrf.mxu0 }
 0x14d   :  { %v1866_v29 = vadd.f32 %v1865_v30, %v1864_v19  ;;  %1426 = vst.msk [vmem:[%s4600_s4 + $0xb0] sm:$0xf] %vm1381_vm3, %v2476_v47  ;;  %v1867_v15 = vsel %vm1779_vm4, %v3993_v5, 0.0  ;;  %v1959_v63 = vmul.f32 %v3993_v5, %v3993_v5  ;;  %v2065_v20 = vadd.f32 %v2064_v16, %v2063_v9  ;;  %v4231_v42 = vpop.f32.mrf.mxu1 }
 0x14e   :  { %v2415_v22 = vpack.c.bf16 %v4016_v18, %v4016_v18  ;;  %v1627_v25 = vmul.f32 %v3948_v58, %v3948_v58  ;;  %v1732_v21 = vsel %vm121_vm1, %v1625_v24, 0.0  ;;  %v2479_v4 = vpack.c.bf16 %v4031_v53, %v4031_v53  ;;  %v4276_v16 = vpop.f32.mrf.mxu0 }
 0x14f   :  { %v1868_v26 = vadd.f32 %v1867_v15, %v1866_v29  ;;  %v1871_v6 = vsel %vm1779_vm4, %v3963_v28, 0.0  ;;  %v1961_v5 = vmul.f32 %v3963_v28, %v3963_v28  ;;  %v1733_v17 = vadd.f32 %v1732_v21, %v1731_v39 }
 0x150   :  { %1108 = vst.msk [vmem:[%s4599_s3 + $0xbc] sm:$0xf] %vm1060_vm2, %v2415_v22  ;;  %v2413_v58 = vpack.c.bf16 %v4048_v1, %v4048_v1  ;;  %v2066_v31 = vsel %vm1779_vm4, %v1959_v63, 0.0  ;;  %v1628_v27 = vmul.f32 %v4016_v18, %v4016_v18  ;;  %v1535_v28 = vsel %vm121_vm1, %v4048_v1, 0.0 }
 0x151   :  { %1429 = vst.msk [vmem:[%s4600_s4 + $0xbc] sm:$0xf] %vm1381_vm3, %v2479_v4  ;;  %v1626_v34 = vmul.f32 %v4048_v1, %v4048_v1  ;;  %v2067_v35 = vadd.f32 %v2066_v31, %v2065_v20  ;;  %v1536_v48 = vadd.f32 %v1535_v28, %v1534_v13  ;;  %v2477_v56 = vpack.c.bf16 %v4063_v50, %v4063_v50 }
 0x152   :  { %1106 = vst.msk [vmem:[%s4599_s3 + $0xb4] sm:$0xf] %vm1060_vm2, %v2413_v58  ;;  %v1869_v54 = vsel %vm1779_vm4, %v4063_v50, 0.0  ;;  %v1960_v1 = vmul.f32 %v4063_v50, %v4063_v50  ;;  %v2418_v45 = vpack.c.bf16 %v4076_v10, %v4076_v10  ;;  %v1736_v55 = vsel %vm121_vm1, %v1627_v25, 0.0 }
 0x153   :  { %v1734_v7 = vsel %vm121_vm1, %v1626_v34, 0.0  ;;  %v1870_v37 = vadd.f32 %v1869_v54, %v1868_v26  ;;  %v2070_v11 = vsel %vm1779_vm4, %v1961_v5, 0.0  ;;  %v1538_v36 = vadd.f32 %v1537_v51, %v1536_v48  ;;  %1427 = vst.msk [vmem:[%s4600_s4 + $0xb4] sm:$0xf] %vm1381_vm3, %v2477_v56 }
 0x154   :  { %v1735_v49 = vadd.f32 %v1734_v7, %v1733_v17  ;;  %v1962_v8 = vmul.f32 %v4031_v53, %v4031_v53  ;;  %v2068_v46 = vsel %vm1779_vm4, %v1960_v1, 0.0  ;;  %1111 = vst.msk [vmem:[%s4599_s3 + $0xc8] sm:$0xf] %vm1060_vm2, %v2418_v45  ;;  %v2482_v62 = vpack.c.bf16 %v4093_v59, %v4093_v59  ;;  %v4316_v17 = vpop.f32.mrf.mxu0 }
 0x155   :  { %v1872_v50 = vadd.f32 %v1871_v6, %v1870_v37  ;;  %v1539_v19 = vsel %vm121_vm1, %v4016_v18, 0.0  ;;  %v1873_v61 = vsel %vm1779_vm4, %v4031_v53, 0.0  ;;  %v2069_v60 = vadd.f32 %v2068_v46, %v2067_v35  ;;  %v4263_v18 = vpop.f32.mrf.mxu1 }
 0x156   :  { %v1737_v0 = vadd.f32 %v1736_v55, %v1735_v49  ;;  %v1738_v30 = vsel %vm121_vm1, %v1628_v27, 0.0  ;;  %1432 = vst.msk [vmem:[%s4600_s4 + $0xc8] sm:$0xf] %vm1381_vm3, %v2482_v62  ;;  %v2416_v33 = vpack.c.bf16 %v4116_v12, %v4116_v12  ;;  %v1540_v43 = vadd.f32 %v1539_v19, %v1538_v36  ;;  %v4348_v36 = vpop.f32.mrf.mxu0 }
 0x157   :  { %v1629_v2 = vmul.f32 %v4116_v12, %v4116_v12  ;;  %v2071_v38 = vadd.f32 %v2070_v11, %v2069_v60  ;;  %v1541_v53 = vsel %vm121_vm1, %v4116_v12, 0.0  ;;  %v2480_v24 = vpack.c.bf16 %v4131_v41, %v4131_v41  ;;  %v4293_v25 = vpop.f32.mrf.mxu1 }
 0x158   :  { %v1739_v32 = vadd.f32 %v1738_v30, %v1737_v0  ;;  %v2072_v9 = vsel %vm1779_vm4, %v1962_v8, 0.0  ;;  %v1545_v40 = vsel %vm121_vm1, %v4076_v10, 0.0  ;;  %1109 = vst.msk [vmem:[%s4599_s3 + $0xc0] sm:$0xf] %vm1060_vm2, %v2416_v33  ;;  %v1542_v39 = vadd.f32 %v1541_v53, %v1540_v43 }
 0x159   :  { %v1874_v47 = vadd.f32 %v1873_v61, %v1872_v50  ;;  %1430 = vst.msk [vmem:[%s4600_s4 + $0xc0] sm:$0xf] %vm1381_vm3, %v2480_v24  ;;  %v1875_v12 = vsel %vm1779_vm4, %v4131_v41, 0.0  ;;  %v1963_v51 = vmul.f32 %v4131_v41, %v4131_v41  ;;  %v2073_v13 = vadd.f32 %v2072_v9, %v2071_v38  ;;  %v4331_v56 = vpop.f32.mrf.mxu1 }
 0x15a   :  { %v2419_v29 = vpack.c.bf16 %v4148_v57, %v4148_v57  ;;  %v1631_v15 = vmul.f32 %v4076_v10, %v4076_v10  ;;  %v1740_v63 = vsel %vm121_vm1, %v1629_v2, 0.0  ;;  %v2483_v22 = vpack.c.bf16 %v4163_v14, %v4163_v14 }
 0x15b   :  { %v1876_v20 = vadd.f32 %v1875_v12, %v1874_v47  ;;  %v1879_v21 = vsel %vm1779_vm4, %v4093_v59, 0.0  ;;  %v1965_v41 = vmul.f32 %v4093_v59, %v4093_v59  ;;  %v1741_v26 = vadd.f32 %v1740_v63, %v1739_v32  ;;  %v480_v32 = vpop.f32.mrf.mxu0 }
 0x15c   :  { %1112 = vst.msk [vmem:[%s4599_s3 + $0xcc] sm:$0xf] %vm1060_vm2, %v2419_v29  ;;  %v2417_v10 = vpack.c.bf16 %v4176_v3, %v4176_v3  ;;  %v2074_v4 = vsel %vm1779_vm4, %v1963_v51, 0.0  ;;  %v1632_v6 = vmul.f32 %v4148_v57, %v4148_v57  ;;  %v1543_v59 = vsel %vm121_vm1, %v4176_v3, 0.0 }
 0x15d   :  { %1433 = vst.msk [vmem:[%s4600_s4 + $0xcc] sm:$0xf] %vm1381_vm3, %v2483_v22  ;;  %v1630_v5 = vmul.f32 %v4176_v3, %v4176_v3  ;;  %v2075_v58 = vadd.f32 %v2074_v4, %v2073_v13  ;;  %v1544_v31 = vadd.f32 %v1543_v59, %v1542_v39  ;;  %v2481_v27 = vpack.c.bf16 %v4193_v23, %v4193_v23 }
 0x15e   :  { %1110 = vst.msk [vmem:[%s4599_s3 + $0xc4] sm:$0xf] %vm1060_vm2, %v2417_v10  ;;  %v1877_v28 = vsel %vm1779_vm4, %v4193_v23, 0.0  ;;  %v1964_v3 = vmul.f32 %v4193_v23, %v4193_v23  ;;  %v2422_v48 = vpack.c.bf16 %v4216_v52, %v4216_v52  ;;  %v1744_v54 = vsel %vm121_vm1, %v1631_v15, 0.0 }
 0x15f   :  { %v1742_v34 = vsel %vm121_vm1, %v1630_v5, 0.0  ;;  %v1878_v35 = vadd.f32 %v1877_v28, %v1876_v20  ;;  %v2078_v7 = vsel %vm1779_vm4, %v1965_v41, 0.0  ;;  %v1546_v37 = vadd.f32 %v1545_v40, %v1544_v31  ;;  %1431 = vst.msk [vmem:[%s4600_s4 + $0xc4] sm:$0xf] %vm1381_vm3, %v2481_v27 }
 0x160   :  { %v1743_v1 = vadd.f32 %v1742_v34, %v1741_v26  ;;  %v1966_v45 = vmul.f32 %v4163_v14, %v4163_v14  ;;  %v2076_v55 = vsel %vm1779_vm4, %v1964_v3, 0.0  ;;  %1115 = vst.msk [vmem:[%s4599_s3 + $0xd8] sm:$0xf] %vm1060_vm2, %v2422_v48  ;;  %v2486_v11 = vpack.c.bf16 %v4231_v42, %v4231_v42 }
 0x161   :  { %v1880_v23 = vadd.f32 %v1879_v21, %v1878_v35  ;;  %v1547_v49 = vsel %vm121_vm1, %v4148_v57, 0.0  ;;  %v1881_v8 = vsel %vm1779_vm4, %v4163_v14, 0.0  ;;  %v2077_v46 = vadd.f32 %v2076_v55, %v2075_v58  ;;  %v4363_v57 = vpop.f32.mrf.mxu1  ;;  %v4412_v21 = vpop.f32.mrf.mxu0 }
 0x162   :  { %v1745_v50 = vadd.f32 %v1744_v54, %v1743_v1  ;;  %v1746_v62 = vsel %vm121_vm1, %v1632_v6, 0.0  ;;  %1436 = vst.msk [vmem:[%s4600_s4 + $0xd8] sm:$0xf] %vm1381_vm3, %v2486_v11  ;;  %v2420_v19 = vpack.c.bf16 %v4248_v44, %v4248_v44  ;;  %v1548_v61 = vadd.f32 %v1547_v49, %v1546_v37 }
 0x163   :  { %v1633_v0 = vmul.f32 %v4248_v44, %v4248_v44  ;;  %v2079_v60 = vadd.f32 %v2078_v7, %v2077_v46  ;;  %v1549_v14 = vsel %vm121_vm1, %v4248_v44, 0.0  ;;  %v2484_v33 = vpack.c.bf16 %v4263_v18, %v4263_v18  ;;  %v773_v13 = vpop.f32.mrf.mxu1  ;;  %v483_v54 = vpop.f32.mrf.mxu0 }
 0x164   :  { %v1747_v30 = vadd.f32 %v1746_v62, %v1745_v50  ;;  %v2080_v43 = vsel %vm1779_vm4, %v1966_v45, 0.0  ;;  %v1553_v2 = vsel %vm121_vm1, %v4216_v52, 0.0  ;;  %1113 = vst.msk [vmem:[%s4599_s3 + $0xd0] sm:$0xf] %vm1060_vm2, %v2420_v19  ;;  %v1550_v38 = vadd.f32 %v1549_v14, %v1548_v61 }
 0x165   :  { %v1882_v53 = vadd.f32 %v1881_v8, %v1880_v23  ;;  %1434 = vst.msk [vmem:[%s4600_s4 + $0xd0] sm:$0xf] %vm1381_vm3, %v2484_v33  ;;  %v1883_v44 = vsel %vm1779_vm4, %v4263_v18, 0.0  ;;  %v1967_v24 = vmul.f32 %v4263_v18, %v4263_v18  ;;  %v2081_v9 = vadd.f32 %v2080_v43, %v2079_v60  ;;  %v4427_v58 = vpop.f32.mrf.mxu1  ;;  %v4461_v60 = vpop.f32.mrf.mxu0 }
 0x166   :  { %v2423_v40 = vpack.c.bf16 %v4276_v16, %v4276_v16  ;;  %v1635_v39 = vmul.f32 %v4216_v52, %v4216_v52  ;;  %v1748_v47 = vsel %vm121_vm1, %v1633_v0, 0.0  ;;  %v2487_v51 = vpack.c.bf16 %v4293_v25, %v4293_v25 }
 0x167   :  { %v1884_v12 = vadd.f32 %v1883_v44, %v1882_v53  ;;  %v1887_v29 = vsel %vm1779_vm4, %v4231_v42, 0.0  ;;  %v1969_v18 = vmul.f32 %v4231_v42, %v4231_v42  ;;  %v1749_v15 = vadd.f32 %v1748_v47, %v1747_v30  ;;  %v776_v8 = vpop.f32.mrf.mxu1 }
 0x168   :  { %1116 = vst.msk [vmem:[%s4599_s3 + $0xdc] sm:$0xf] %vm1060_vm2, %v2423_v40  ;;  %v2421_v52 = vpack.c.bf16 %v4316_v17, %v4316_v17  ;;  %v2082_v63 = vsel %vm1779_vm4, %v1967_v24, 0.0  ;;  %v1636_v20 = vmul.f32 %v4276_v16, %v4276_v16  ;;  %v1551_v42 = vsel %vm121_vm1, %v4316_v17, 0.0 }
 0x169   :  { %1437 = vst.msk [vmem:[%s4600_s4 + $0xdc] sm:$0xf] %vm1381_vm3, %v2487_v51  ;;  %v1634_v22 = vmul.f32 %v4316_v17, %v4316_v17  ;;  %v2083_v41 = vadd.f32 %v2082_v63, %v2081_v9  ;;  %v1552_v26 = vadd.f32 %v1551_v42, %v1550_v38  ;;  %v2485_v10 = vpack.c.bf16 %v4331_v56, %v4331_v56  ;;  %v4475_v44 = vpop.f32.mrf.mxu1  ;;  %v496_v51 = vpop.f32.mrf.mxu0 }
 0x16a   :  { %1114 = vst.msk [vmem:[%s4599_s3 + $0xd4] sm:$0xf] %vm1060_vm2, %v2421_v52  ;;  %v1885_v4 = vsel %vm1779_vm4, %v4331_v56, 0.0  ;;  %v1968_v5 = vmul.f32 %v4331_v56, %v4331_v56  ;;  %v2426_v17 = vpack.c.bf16 %v4348_v36, %v4348_v36  ;;  %v1752_v31 = vsel %vm121_vm1, %v1635_v39, 0.0 }
 0x16b   :  { %v1750_v6 = vsel %vm121_vm1, %v1634_v22, 0.0  ;;  %v1886_v59 = vadd.f32 %v1885_v4, %v1884_v12  ;;  %v2086_v27 = vsel %vm1779_vm4, %v1969_v18, 0.0  ;;  %v1554_v28 = vadd.f32 %v1553_v2, %v1552_v26  ;;  %1435 = vst.msk [vmem:[%s4600_s4 + $0xd4] sm:$0xf] %vm1381_vm3, %v2485_v10  ;;  %v789_v22 = vpop.f32.mrf.mxu1 }
 0x16c   :  { %v1751_v34 = vadd.f32 %v1750_v6, %v1749_v15  ;;  %v1970_v35 = vmul.f32 %v4293_v25, %v4293_v25  ;;  %v2084_v48 = vsel %vm1779_vm4, %v1968_v5, 0.0  ;;  %1119 = vst.msk [vmem:[%s4599_s3 + $0xe8] sm:$0xf] %vm1060_vm2, %v2426_v17  ;;  %v2490_v56 = vpack.c.bf16 %v4363_v57, %v4363_v57 }
 0x16d   :  { %v1888_v3 = vadd.f32 %v1887_v29, %v1886_v59  ;;  %v1555_v7 = vsel %vm121_vm1, %v4276_v16, 0.0  ;;  %v1889_v37 = vsel %vm1779_vm4, %v4293_v25, 0.0  ;;  %v2085_v45 = vadd.f32 %v2084_v48, %v2083_v41 }
 0x16e   :  { %v1753_v1 = vadd.f32 %v1752_v31, %v1751_v34  ;;  %v1754_v23 = vsel %vm121_vm1, %v1636_v20, 0.0  ;;  %1440 = vst.msk [vmem:[%s4600_s4 + $0xe8] sm:$0xf] %vm1381_vm3, %v2490_v56  ;;  %v2424_v55 = vpack.c.bf16 %v480_v32, %v480_v32  ;;  %v1556_v11 = vadd.f32 %v1555_v7, %v1554_v28  ;;  %v2627_v31 = vpop.f32.mrf.mxu0  ;;  %v2693_v7 = vpop.f32.mrf.mxu1 }
 0x16f   :  { %v1637_v49 = vmul.f32 %v480_v32, %v480_v32  ;;  %v2087_v50 = vadd.f32 %v2086_v27, %v2085_v45  ;;  %v1557_v46 = vsel %vm121_vm1, %v480_v32, 0.0  ;;  %v2488_v62 = vpack.c.bf16 %v773_v13, %v773_v13 }
 0x170   :  { %v1755_v16 = vadd.f32 %v1754_v23, %v1753_v1  ;;  %v2088_v25 = vsel %vm1779_vm4, %v1970_v35, 0.0  ;;  %v1561_v19 = vsel %vm121_vm1, %v4348_v36, 0.0  ;;  %1117 = vst.msk [vmem:[%s4599_s3 + $0xe0] sm:$0xf] %vm1060_vm2, %v2424_v55  ;;  %v1558_v61 = vadd.f32 %v1557_v46, %v1556_v11  ;;  %v499_v11 = vpop.f32.mrf.mxu0 }
 0x171   :  { %v1890_v0 = vadd.f32 %v1889_v37, %v1888_v3  ;;  %1438 = vst.msk [vmem:[%s4600_s4 + $0xe0] sm:$0xf] %vm1381_vm3, %v2488_v62  ;;  %v1891_v14 = vsel %vm1779_vm4, %v773_v13, 0.0  ;;  %v1971_v30 = vmul.f32 %v773_v13, %v773_v13  ;;  %v2089_v33 = vadd.f32 %v2088_v25, %v2087_v50 }
 0x172   :  { %v2427_v43 = vpack.c.bf16 %v4412_v21, %v4412_v21  ;;  %v1639_v2 = vmul.f32 %v4348_v36, %v4348_v36  ;;  %v1756_v38 = vsel %vm121_vm1, %v1637_v49, 0.0  ;;  %v2491_v32 = vpack.c.bf16 %v4427_v58, %v4427_v58 }
 0x173   :  { %v1892_v53 = vadd.f32 %v1891_v14, %v1890_v0  ;;  %v1895_v24 = vsel %vm1779_vm4, %v4363_v57, 0.0  ;;  %v1973_v9 = vmul.f32 %v4363_v57, %v4363_v57  ;;  %v1757_v40 = vadd.f32 %v1756_v38, %v1755_v16 }
 0x174   :  { %1120 = vst.msk [vmem:[%s4599_s3 + $0xec] sm:$0xf] %vm1060_vm2, %v2427_v43  ;;  %v2425_v36 = vpack.c.bf16 %v483_v54, %v483_v54  ;;  %v2090_v39 = vsel %vm1779_vm4, %v1971_v30, 0.0  ;;  %v1640_v47 = vmul.f32 %v4412_v21, %v4412_v21  ;;  %v1559_v12 = vsel %vm121_vm1, %v483_v54, 0.0 }
 0x175   :  { %1441 = vst.msk [vmem:[%s4600_s4 + $0xec] sm:$0xf] %vm1381_vm3, %v2491_v32  ;;  %v1638_v57 = vmul.f32 %v483_v54, %v483_v54  ;;  %v2091_v13 = vadd.f32 %v2090_v39, %v2089_v33  ;;  %v1560_v29 = vadd.f32 %v1559_v12, %v1558_v61  ;;  %v2489_v18 = vpack.c.bf16 %v776_v8, %v776_v8 }
 0x176   :  { %1118 = vst.msk [vmem:[%s4599_s3 + $0xe4] sm:$0xf] %vm1060_vm2, %v2425_v36  ;;  %v1893_v15 = vsel %vm1779_vm4, %v776_v8, 0.0  ;;  %v1972_v20 = vmul.f32 %v776_v8, %v776_v8  ;;  %v2430_v42 = vpack.c.bf16 %v4461_v60, %v4461_v60  ;;  %v1760_v41 = vsel %vm121_vm1, %v1639_v2, 0.0 }
 0x177   :  { %v1758_v52 = vsel %vm121_vm1, %v1638_v57, 0.0  ;;  %v1894_v63 = vadd.f32 %v1893_v15, %v1892_v53  ;;  %v2094_v26 = vsel %vm1779_vm4, %v1973_v9, 0.0  ;;  %v1562_v10 = vadd.f32 %v1561_v19, %v1560_v29  ;;  %1439 = vst.msk [vmem:[%s4600_s4 + $0xe4] sm:$0xf] %vm1381_vm3, %v2489_v18  ;;  %v792_v19 = vpop.f32.mrf.mxu1 }
 0x178   :  { %v1759_v4 = vadd.f32 %v1758_v52, %v1757_v40  ;;  %v1974_v6 = vmul.f32 %v4427_v58, %v4427_v58  ;;  %v2092_v5 = vsel %vm1779_vm4, %v1972_v20, 0.0  ;;  %1123 = vst.msk [vmem:[%s4599_s3 + $0xf8] sm:$0xf] %vm1060_vm2, %v2430_v42  ;;  %v2494_v17 = vpack.c.bf16 %v4475_v44, %v4475_v44 }
 0x179   :  { %v1896_v59 = vadd.f32 %v1895_v24, %v1894_v63  ;;  %v1563_v27 = vsel %vm121_vm1, %v4412_v21, 0.0  ;;  %v1897_v28 = vsel %vm1779_vm4, %v4427_v58, 0.0  ;;  %v2093_v35 = vadd.f32 %v2092_v5, %v2091_v13 }
 0x17a   :  { %v1761_v34 = vadd.f32 %v1760_v41, %v1759_v4  ;;  %v1762_v3 = vsel %vm121_vm1, %v1640_v47, 0.0  ;;  %1444 = vst.msk [vmem:[%s4600_s4 + $0xf8] sm:$0xf] %vm1381_vm3, %v2494_v17  ;;  %v2428_v48 = vpack.c.bf16 %v496_v51, %v496_v51  ;;  %v1564_v56 = vadd.f32 %v1563_v27, %v1562_v10 }
 0x17b   :  { %v1641_v54 = vmul.f32 %v496_v51, %v496_v51  ;;  %v2095_v37 = vadd.f32 %v2094_v26, %v2093_v35  ;;  %v1565_v1 = vsel %vm121_vm1, %v496_v51, 0.0  ;;  %v2492_v45 = vpack.c.bf16 %v789_v22, %v789_v22 }
 0x17c   :  { %v1763_v21 = vadd.f32 %v1762_v3, %v1761_v34  ;;  %v2096_v58 = vsel %vm1779_vm4, %v1974_v6, 0.0  ;;  %1121 = vst.msk [vmem:[%s4599_s3 + $0xf0] sm:$0xf] %vm1060_vm2, %v2428_v48  ;;  %v1566_v23 = vadd.f32 %v1565_v1, %v1564_v56  ;;  %v1898_v55 = vadd.f32 %v1897_v28, %v1896_v59 }
 0x17d   :  { %1442 = vst.msk [vmem:[%s4600_s4 + $0xf0] sm:$0xf] %vm1381_vm3, %v2492_v45  ;;  %v1899_v49 = vsel %vm1779_vm4, %v789_v22, 0.0  ;;  %v1975_v8 = vmul.f32 %v789_v22, %v789_v22  ;;  %v2097_v50 = vadd.f32 %v2096_v58, %v2095_v37  ;;  %v2431_v46 = vpack.c.bf16 %v2627_v31, %v2627_v31 }
 0x17e   :  { %v1764_v16 = vsel %vm121_vm1, %v1641_v54, 0.0  ;;  %v1900_v62 = vadd.f32 %v1899_v49, %v1898_v55  ;;  %v2495_v25 = vpack.c.bf16 %v2693_v7, %v2693_v7  ;;  %v1569_v61 = vsel %vm121_vm1, %v4461_v60, 0.0 }
 0x17f   :  { %v1643_v0 = vmul.f32 %v4461_v60, %v4461_v60  ;;  %v1765_v14 = vadd.f32 %v1764_v16, %v1763_v21  ;;  %1124 = vst.msk [vmem:[%s4599_s3 + $0xfc] sm:$0xf] %vm1060_vm2, %v2431_v46  ;;  %v2429_v30 = vpack.c.bf16 %v499_v11, %v499_v11  ;;  %v1977_v33 = vmul.f32 %v4475_v44, %v4475_v44 }
 0x180   :  { %v2098_v43 = vsel %vm1779_vm4, %v1975_v8, 0.0  ;;  %1445 = vst.msk [vmem:[%s4600_s4 + $0xfc] sm:$0xf] %vm1381_vm3, %v2495_v25  ;;  %v1567_v2 = vsel %vm121_vm1, %v499_v11, 0.0  ;;  %v1642_v60 = vmul.f32 %v499_v11, %v499_v11  ;;  %v2493_v32 = vpack.c.bf16 %v792_v19, %v792_v19 }
 0x181   :  { %v2099_v38 = vadd.f32 %v2098_v43, %v2097_v50  ;;  %1122 = vst.msk [vmem:[%s4599_s3 + $0xf4] sm:$0xf] %vm1060_vm2, %v2429_v30  ;;  %v1568_v53 = vadd.f32 %v1567_v2, %v1566_v23  ;;  %v1901_v24 = vsel %vm1779_vm4, %v792_v19, 0.0  ;;  %v1644_v9 = vmul.f32 %v2627_v31, %v2627_v31  ;;  %s2786_s3 = smov [#allocation2]  }
 0x182   :  { %v1766_v40 = vsel %vm121_vm1, %v1642_v60, 0.0  ;;  %v1902_v36 = vadd.f32 %v1901_v24, %v1900_v62  ;;  %v1976_v39 = vmul.f32 %v792_v19, %v792_v19  ;;  %v1768_v47 = vsel %vm121_vm1, %v1643_v0, 0.0  ;;  %1443 = vst.msk [vmem:[%s4600_s4 + $0xf4] sm:$0xf] %vm1381_vm3, %v2493_v32  ;;  %s2123_s4 = sshll.u32 %s2786_s3, 4  ;;  %s2124_s4 = int_to_ptr.vmem [resolvable:$true] %s2123_s4 }
 0x183   :  { %v1903_v12 = vsel %vm1779_vm4, %v4475_v44, 0.0  ;;  %v1570_v57 = vadd.f32 %v1569_v61, %v1568_v53  ;;  %v1767_v51 = vadd.f32 %v1766_v40, %v1765_v14  ;;  %v1571_v13 = vsel %vm121_vm1, %v2627_v31, 0.0  ;;  %s2700_s26 = scalar_lea.vmem %s2124_s4, 16  ;;  %s2704_s27 = scalar_lea.vmem %s2124_s4, 32 }
 0x184   :  { %v1978_v29 = vmul.f32 %v2693_v7, %v2693_v7  ;;  %v1904_v18 = vadd.f32 %v1903_v12, %v1902_v36  ;;  %v2100_v15 = vsel %vm1779_vm4, %v1976_v39, 0.0  ;;  %v1905_v52 = vsel %vm1779_vm4, %v2693_v7, 0.0  ;;  %p2701_p0 = scmp.ne.s32.totalorder %s2124_s4, %s2700_s26  ;;  %p2705_p1 = scmp.lt.s32.totalorder %s2124_s4, %s2124_s4 }
 0x185   :  { %v1572_v63 = vadd.f32 %v1571_v13, %v1570_v57  ;;  %v1769_v20 = vadd.f32 %v1768_v47, %v1767_v51  ;;  %v2101_v42 = vadd.f32 %v2100_v15, %v2099_v38  ;;  %v2102_v44 = vsel %vm1779_vm4, %v1977_v33, 0.0  ;;  %p2706_p2 = scmp.lt.s32.totalorder %s2704_s27, %s2700_s26 }
 0x186   :  { %v1770_v22 = vsel %vm121_vm1, %v1644_v9, 0.0  ;;  %v1906_v41 = vadd.f32 %v1905_v52, %v1904_v18  ;;  %v2104_v6 = vsel %vm1779_vm4, %v1978_v29, 0.0 }
 0x187   :  { %v2103_v26 = vadd.f32 %v2102_v44, %v2101_v42  ;;  %v1771_v10 = vadd.f32 %v1770_v22, %v1769_v20  ;;  %v1573_v4 = vrot.slane %v1572_v63, 4  ;;  %p2707_p3 = por %p2706_p2, %p2705_p1 }
 0x188   :  { %v1907_v59 = vrot.slane %v1906_v41, 4 }
 0x189   :  { %v2105_v5 = vadd.f32 %v2104_v6, %v2103_v26  ;;  %v1772_v17 = vrot.slane %v1771_v10, 4  ;;  %v1574_v31 = vadd.f32 %v1573_v4, %v1572_v63  ;;  %p2708_p4 = pnand %p2707_p3, %p2701_p0 }
 0x18a   :  { %v1908_v27 = vadd.f32 %v1907_v59, %v1906_v41 }
 0x18b   :  { %v1773_v28 = vadd.f32 %v1772_v17, %v1771_v10  ;;  %v1575_v34 = vrot.slane %v1574_v31, 2  ;;  %v2106_v35 = vrot.slane %v2105_v5, 4 }
 0x18c   :  { %v1909_v3 = vrot.slane %v1908_v27, 2 }
 0x18d   :  { %v1774_v48 = vrot.slane %v1773_v28, 2  ;;  %v1576_v56 = vadd.f32 %v1575_v34, %v1574_v31  ;;  %v2107_v54 = vadd.f32 %v2106_v35, %v2105_v5 }
 0x18e   :  { %v1910_v7 = vadd.f32 %v1909_v3, %v1908_v27 }
 0x18f   :  { %v1775_v37 = vadd.f32 %v1774_v48, %v1773_v28  ;;  %v1577_v1 = vrot.slane %v1576_v56, 1  ;;  %v2108_v21 = vrot.slane %v2107_v54, 2 }
 0x190   :  { %v1911_v45 = vrot.slane %v1910_v7, 1 }
 0x191   :  { %v1776_v58 = vrot.slane %v1775_v37, 1  ;;  %v1578_v23 = vadd.f32 %v1577_v1, %v1576_v56  ;;  %v2109_v55 = vadd.f32 %v2108_v21, %v2107_v54 }
 0x192   :  { %v1912_v11 = vadd.f32 %v1911_v45, %v1910_v7 }
 0x193   :  { %v1777_v49 = vadd.f32 %v1776_v58, %v1775_v37  ;;  %1580 = vst.msk [vmem:[#allocation2] sm:$0x1] %vm1579_vm5, %v1578_v23  ;;  %v2110_v8 = vrot.slane %v2109_v55, 1 }
 0x194   :  { %2711 = shalt.err (!%p2708_p4)
}
 0x195   :  { %2126 = dma.vmem_to_hbm [thread:$0]  %s2124_s4, 16, %s4601_s5, [#allocation3]   ;;  %1914 = vst.msk [vmem:[#allocation6] sm:$0x1] %vm1913_vm6, %v1912_v11  ;;  %v2111_v50 = vadd.f32 %v2110_v8, %v2109_v55 }
 0x196   :  { %1778 = vst.msk [vmem:[#allocation4] sm:$0x1] %vm1579_vm5, %v1777_v49  ;;  %s2720_s30 = scalar_lea.vmem %s2134_s21, 16  ;;  %s2724_s9 = scalar_lea.vmem %s2134_s21, 32 }
 0x197   :  { %p2721_p5 = scmp.ne.s32.totalorder %s2134_s21, %s2720_s30  ;;  %p2725_p6 = scmp.lt.s32.totalorder %s2134_s21, %s2134_s21 }
 0x198   :  { %p2726_p7 = scmp.lt.s32.totalorder %s2724_s9, %s2720_s30 }
 0x19a   :  { %p2727_p8 = por %p2726_p7, %p2725_p6 }
 0x19c   :  { %p2728_p9 = pnand %p2727_p8, %p2721_p5 }
 0x19e   :  { %2731 = shalt.err (!%p2728_p9)
}
 0x19f   :  { %2136 = dma.vmem_to_hbm [thread:$0]  %s2134_s21, 16, %s4602_s6, [#allocation5]  }
 0x1a0   :  { %s2740_s5 = scalar_lea.vmem %s4573_s23, 16  ;;  %s2744_s12 = scalar_lea.vmem %s4573_s23, 32 }
 0x1a1   :  { %p2741_p10 = scmp.ne.s32.totalorder %s4573_s23, %s2740_s5  ;;  %p2745_p11 = scmp.lt.s32.totalorder %s4573_s23, %s4573_s23 }
 0x1a2   :  { %p2746_p12 = scmp.lt.s32.totalorder %s2744_s12, %s2740_s5 }
 0x1a4   :  { %p2747_p13 = por %p2746_p12, %p2745_p11 }
 0x1a6   :  { %p2748_p0 = pnand %p2747_p13, %p2741_p10 }
 0x1a8   :  { %2751 = shalt.err (!%p2748_p0)
}
 0x1a9   :  { %2146 = dma.vmem_to_hbm [thread:$0]  %s4573_s23, 16, %s4603_s7, [#allocation5]   ;;  %2112 = vst.msk [vmem:[#allocation7] sm:$0x1] %vm1913_vm6, %v2111_v50 }
 0x1aa   :  { %s2760_s14 = scalar_lea.vmem %s2154_s25, 16  ;;  %s2764_s15 = scalar_lea.vmem %s2154_s25, 32 }
 0x1ab   :  { %p2761_p1 = scmp.ne.s32.totalorder %s2154_s25, %s2760_s14  ;;  %p2765_p2 = scmp.lt.s32.totalorder %s2154_s25, %s2154_s25 }
 0x1ac   :  { %p2766_p3 = scmp.lt.s32.totalorder %s2764_s15, %s2760_s14 }
 0x1ae   :  { %p2767_p4 = por %p2766_p3, %p2765_p2 }
 0x1b0   :  { %p2768_p5 = pnand %p2767_p4, %p2761_p1 }
 0x1b2   :  { %2771 = shalt.err (!%p2768_p5)
}
 0x1b3   :  { %2156 = dma.vmem_to_hbm [thread:$0]  %s2154_s25, 16, %s4604_s8, [#allocation8]  }
 0x1b4   :  { %2780 = dma.done.wait [#allocation3], 16  }
 0x1b5   :  { %2781 = vsyncadd [#allocation3], 4294967280 }
 0x1b6   :  { %2782 = dma.done.wait [#allocation5], 32  }
 0x1b7   :  { %2783 = vsyncadd [#allocation5], 4294967264 }
 0x1b8   :  { %2784 = dma.done.wait [#allocation8], 16  }
 0x1b9   :  { %2785 = vsyncadd [#allocation8], 4294967280 }
 0x1ba   :  { %2173 = vsyncpa [#allocation3], 1 }
 0x1bb   :  { %2174 = vsyncpa [#allocation5], 1 }
 0x1bc   :  { %2175 = vsyncpa [#allocation8], 1 }

</bundles_post_ra>
